<compile_context>
chip_gen: v7x
topology: tpu7x:2x2x1
jax: 0.10.0
libtpu: 0.0.40
codegen_flags: <defaults>
</compile_context>

<pallas_src>
import functools
import zlib

import jax
import jax.numpy as jnp
from jax.experimental import pallas as pl
from jax.experimental.pallas import tpu as pltpu


# ----------------------------------------------------------------------------
# small helpers
# ----------------------------------------------------------------------------
def _round_up(x, m):
    return ((x + m - 1) // m) * m


_VMEM_LIMIT_CACHE = []


def _vmem_limit_bytes():
    if not _VMEM_LIMIT_CACHE:
        try:
            cap = int(pltpu.get_tpu_info().vmem_capacity_bytes)
        except Exception:
            cap = 64 * 1024 * 1024          # conservative (v7x-sized) fallback
        _VMEM_LIMIT_CACHE.append(int(min(96 * 1024 * 1024, cap * 3 // 4)))
    return _VMEM_LIMIT_CACHE[0]


def _compiler_params():
    # "parallel" lets Mosaic shard the row-tile grid across v7x's 2 TensorCores;
    # it is a no-op on single-core v5e/v6e.
    return pltpu.CompilerParams(
        dimension_semantics=("parallel",),
        vmem_limit_bytes=_vmem_limit_bytes(),
    )


def _row_tile(m):
    # >=2 (ideally 4) grid steps for the dual-TC chips, tiles up to 512 rows for
    # the memory-bound layers (per-step overhead ~0.35us amortizes, VMEM is tiny).
    m8 = _round_up(max(m, 1), 8)
    if m8 <= 8:
        return 8
    return min(512, _round_up(-(-m8 // 4), 8))


def _pad_rows(x, mp):
    if x.shape[0] == mp:
        return x
    return jnp.pad(x, [(0, mp - x.shape[0])] + [(0, 0)] * (x.ndim - 1))


def _bf16(x):
    return x.astype(jnp.bfloat16)


# ----------------------------------------------------------------------------
# parameters (deterministic, created from shapes on first use, cached)
# ----------------------------------------------------------------------------
_BASE_KEY = jax.random.PRNGKey(0)


def _full_weight(name, in_dim, out_dim):
    key = jax.random.fold_in(_BASE_KEY, zlib.crc32(name.encode()) & 0x7FFFFFFF)
    w = jax.random.normal(key, (in_dim, out_dim), jnp.float32) * (1.0 / jnp.sqrt(in_dim))
    b = jnp.zeros((1, out_dim), jnp.float32)
    return w, b


def _get_linear(params, name, in_dim, out_dim):
    k = ('lin', name, in_dim, out_dim)
    if k not in params:
        params[k] = _full_weight(name, in_dim, out_dim)
    return params[k]


def _get_split_weight(params, name, part_dims, out_dim):
    """One Linear over a concatenated input, pre-split into row blocks so the
    fused kernels can use concat(A,B,..)@W == A@W0 + B@W1 + ...  (cached)."""
    k = ('split', name, tuple(int(d) for d in part_dims), out_dim)
    if k not in params:
        w, b = _full_weight(name, int(sum(part_dims)), out_dim)
        parts, off = [], 0
        for d in part_dims:
            parts.append(w[off:off + d])
            off += d
        params[k] = (tuple(parts), b)
    return params[k]


# ---- block-structured weight builders for the fused group-2 pair logic -------
def _g2_f1_weight(wa, wc, n):
    """[n*d, n*n*od]: output pair p=(i,j) gets f1_i@wa (+ f1_j@wc if permute)."""
    d, od = wa.shape
    W = jnp.zeros((n * d, n * n * od), jnp.float32)
    for i in range(n):
        for j in range(n):
            p = i * n + j
            W = W.at[i * d:(i + 1) * d, p * od:(p + 1) * od].add(wa)
            if wc is not None:
                W = W.at[j * d:(j + 1) * d, p * od:(p + 1) * od].add(wc)
    return W


def _g2_f2_weight(wb, wd, n):
    """[n*n*d, n*n*od]: pair p=(i,j) gets f2_ij@wb (+ f2_ji@wd if permute)."""
    d, od = wb.shape
    W = jnp.zeros((n * n * d, n * n * od), jnp.float32)
    for i in range(n):
        for j in range(n):
            p = i * n + j
            W = W.at[p * d:(p + 1) * d, p * od:(p + 1) * od].add(wb)
            if wd is not None:
                q = j * n + i
                W = W.at[q * d:(q + 1) * d, p * od:(p + 1) * od].add(wd)
    return W


def _build_layer_consts(params, name, *, n, d0_dims, d1_dims, d2_dims, od,
                        permute, groups):
    """All bf16 weights + f32 biases of one NLM layer, kernel-ordered, cached."""
    ck = ('layer_consts', name, n, d0_dims, d1_dims, d2_dims, od,
          bool(permute), groups)
    if ck in params:
        return params[ck]
    consts = []
    eye = jnp.eye(n, dtype=jnp.float32)

    if 0 in groups:   # [f0... | max_i f1... | min_i f1...] @ W0
        parts, b0 = _get_split_weight(params, f'{name}_g0',
                                      d0_dims + d1_dims + d1_dims, od)
        consts += [_bf16(p) for p in parts]
        consts.append(b0)

    if 1 in groups:   # [expand(f0)... | f1_i... | excl-self max f2... | min f2...]
        parts, b1 = _get_split_weight(params, f'{name}_g1',
                                      d0_dims + d1_dims + d2_dims + d2_dims, od)
        idx = 0
        for _ in d0_dims:                         # expand: same contribution per object
            consts.append(_bf16(jnp.tile(parts[idx], (1, n))))
            idx += 1
        for _ in d1_dims:                         # per-object block-diag
            consts.append(_bf16(jnp.kron(eye, parts[idx])))
            idx += 1
        for _ in d2_dims:                         # exclude-self max parts
            consts.append(_bf16(jnp.kron(eye, parts[idx])))
            idx += 1
        for _ in d2_dims:                         # exclude-self min parts
            consts.append(_bf16(jnp.kron(eye, parts[idx])))
            idx += 1
        consts.append(jnp.tile(b1, (1, n)))

    if 2 in groups:   # [f1_i | f2_ij | f1_j | f2_ji] per pair, fully batched
        p2 = d1_dims + d2_dims + ((d1_dims + d2_dims) if permute else ())
        parts, b2 = _get_split_weight(params, f'{name}_g2', p2, od)
        n1, n2 = len(d1_dims), len(d2_dims)
        # TODO(synk): these block weights grow ~n^2 (f1) / n^4 (f2); for large
        #             object counts fall back to per-object kron(I_n, .) dots.
        for s in range(n1):
            wa = parts[s]
            wc = parts[n1 + n2 + s] if permute else None
            consts.append(_bf16(_g2_f1_weight(wa, wc, n)))
        for s in range(n2):
            wb = parts[n1 + s]
            wd = parts[n1 + n2 + n1 + s] if permute else None
            consts.append(_bf16(_g2_f2_weight(wb, wd, n)))
        consts.append(jnp.tile(b2, (1, n * n)))

    params[ck] = consts
    return consts


# ----------------------------------------------------------------------------
# kernel: one fused NLM layer (only the groups that matter for the final output)
#   inputs (lane slabs): f0 slabs [TM,d], f1 slabs [TM,n*d], f2 slabs [TM,n*n*d]
#   layer 0 additionally fuses InputTransformNN (block-diag dot on raw unary).
# ----------------------------------------------------------------------------
def _nlm_layer_kernel(*refs, n, d0_dims, d1_dims, d2_dims, od, groups,
                      fuse_it, beta, emit_f0_full):
    it = iter(refs)
    f0_refs = [next(it) for _ in d0_dims]
    unary_ref = next(it) if fuse_it else None
    f1_refs = None if fuse_it else [next(it) for _ in d1_dims]
    f2_refs = [next(it) for _ in d2_dims]

    if fuse_it:
        w_it = next(it)
        b_it = next(it)
    if 0 in groups:
        g0_f0_w = [next(it) for _ in d0_dims]
        g0_max_w = [next(it) for _ in d1_dims]
        g0_min_w = [next(it) for _ in d1_dims]
        g0_b = next(it)
    if 1 in groups:
        g1_f0_w = [next(it) for _ in d0_dims]
        g1_f1_w = [next(it) for _ in d1_dims]
        g1_max_w = [next(it) for _ in d2_dims]
        g1_min_w = [next(it) for _ in d2_dims]
        g1_b = next(it)
    if 2 in groups:
        g2_f1_w = [next(it) for _ in d1_dims]
        g2_f2_w = [next(it) for _ in d2_dims]
        g2_b = next(it)

    f1p_ref = next(it) if fuse_it else None
    o0_ref = next(it) if 0 in groups else None
    o1_ref = next(it) if 1 in groups else None
    o2_ref = next(it) if 2 in groups else None

    def bdot(x, w_ref):   # bf16 MXU operands (weights already bf16), f32 accumulate
        return jnp.dot(x.astype(jnp.bfloat16), w_ref[...],
                       preferred_element_type=jnp.float32)

    # ---- fused InputTransformNN: sigmoid(beta * (unary @ kron(I_n, W_it) + b))
    if fuse_it:
        z = bdot(unary_ref[...], w_it) + b_it[...]
        f1p_ref[...] = jax.nn.sigmoid(beta * z)
        f1_refs = [f1p_ref]            # re-read slices from the VMEM output block

    f0_vals = [r[...] for r in f0_refs]           # nullary slabs are tiny

    # ---- group 0 (nullary)
    if 0 in groups:
        z0 = g0_b[...]
        for s in range(len(d0_dims)):
            z0 = z0 + bdot(f0_vals[s], g0_f0_w[s])
        for s, d in enumerate(d1_dims):
            fr = f1_refs[s]
            rmax = fr[:, 0:d]
            rmin = rmax
            for i in range(1, n):
                v = fr[:, i * d:(i + 1) * d]
                rmax = jnp.maximum(rmax, v)
                rmin = jnp.minimum(rmin, v)
            z0 = z0 + bdot(rmax, g0_max_w[s]) + bdot(rmin, g0_min_w[s])
        new0 = jax.nn.sigmoid(z0)
        if emit_f0_full:               # last layer: full nullary feature, lane-slice stores
            off = 0
            for s, d in enumerate(d0_dims):
                o0_ref[:, off:off + d] = f0_vals[s]
                off += d
            o0_ref[:, off:off + od] = new0
        else:
            o0_ref[...] = new0

    # ---- group 1 (unary): one [TM, n*od] slab from block-structured dots
    if 1 in groups:
        z1 = g1_b[...]
        for s in range(len(d0_dims)):
            z1 = z1 + bdot(f0_vals[s], g1_f0_w[s])
        for s in range(len(d1_dims)):
            z1 = z1 + bdot(f1_refs[s][...], g1_f1_w[s])
        for s, d in enumerate(d2_dims):
            fr = f2_refs[s]
            emax, emin = [], []
            for i in range(n):
                mx = mn = None
                for j in range(n):
                    if j == i:
                        continue
                    v = fr[:, (i * n + j) * d:(i * n + j + 1) * d]
                    mx = v if mx is None else jnp.maximum(mx, v)
                    mn = v if mn is None else jnp.minimum(mn, v)
                if mx is None:          # n == 1: empty exclude-self reduce
                    mx = jnp.zeros_like(fr[:, 0:d])
                    mn = jnp.ones_like(mx)
                emax.append(mx)
                emin.append(mn)
            z1 = z1 + bdot(jnp.concatenate(emax, axis=-1), g1_max_w[s])
            z1 = z1 + bdot(jnp.concatenate(emin, axis=-1), g1_min_w[s])
        o1_ref[...] = jax.nn.sigmoid(z1)

    # ---- group 2 (binary, permute): 1-2 full-width dots, lane-dense store
    if 2 in groups:
        z2 = g2_b[...]
        for s in range(len(d1_dims)):
            z2 = z2 + bdot(f1_refs[s][...], g2_f1_w[s])
        for s in range(len(d2_dims)):
            z2 = z2 + bdot(f2_refs[s][...], g2_f2_w[s])
        o2_ref[...] = jax.nn.sigmoid(z2)


def pallas_nlm_layer(params, name, f0_slabs, f1_slabs, f2_slabs, *, n, od,
                     permute, groups, fuse_it=None, emit_f0_full=False):
    groups = tuple(sorted(set(int(g) for g in groups)))
    assert 0 in groups
    if 1 not in groups and 2 not in groups:
        f2_slabs = []                       # binary slabs only feed groups 1/2

    m = f0_slabs[0].shape[0]
    d0_dims = tuple(int(a.shape[1]) for a in f0_slabs)
    if fuse_it is not None:
        assert not f1_slabs
        d1_dims = (int(fuse_it['out']),)
    else:
        d1_dims = tuple(int(a.shape[1]) // n for a in f1_slabs)
    d2_dims = tuple(int(a.shape[1]) // (n * n) for a in f2_slabs)

    consts = []
    if fuse_it is not None:
        du = int(fuse_it['unary'].shape[1]) // n
        ck = ('it_consts', name, n, du, int(fuse_it['out']))
        if ck not in params:
            params[ck] = (_bf16(jnp.kron(jnp.eye(n, dtype=jnp.float32), fuse_it['w'])),
                          jnp.tile(fuse_it['b'], (1, n)))
        consts += list(params[ck])
    consts += _build_layer_consts(params, name, n=n, d0_dims=d0_dims,
                                  d1_dims=d1_dims, d2_dims=d2_dims, od=od,
                                  permute=permute, groups=groups)

    tm = _row_tile(m)
    mp = _round_up(m, tm)
    row_args = [_pad_rows(a, mp) for a in f0_slabs]
    if fuse_it is not None:
        row_args.append(_pad_rows(fuse_it['unary'], mp))
    else:
        row_args += [_pad_rows(a, mp) for a in f1_slabs]
    row_args += [_pad_rows(a, mp) for a in f2_slabs]

    in_specs = ([pl.BlockSpec((tm, int(a.shape[1])), lambda i: (i, 0)) for a in row_args]
                + [pl.BlockSpec(a.shape, lambda i: (0, 0)) for a in consts])

    out_names, out_shapes, out_specs = [], [], []

    def add_out(nm, width):
        out_names.append(nm)
        out_shapes.append(jax.ShapeDtypeStruct((mp, width), jnp.float32))
        out_specs.append(pl.BlockSpec((tm, width), lambda i: (i, 0)))

    if fuse_it is not None:
        add_out('f1p', n * int(fuse_it['out']))
    add_out('o0', (sum(d0_dims) + od) if emit_f0_full else od)
    if 1 in groups:
        add_out('o1', n * od)
    if 2 in groups:
        add_out('o2', n * n * od)

    kernel = functools.partial(
        _nlm_layer_kernel, n=n, d0_dims=d0_dims, d1_dims=d1_dims,
        d2_dims=d2_dims, od=od, groups=groups, fuse_it=(fuse_it is not None),
        beta=(float(fuse_it['beta']) if fuse_it is not None else 1.0),
        emit_f0_full=bool(emit_f0_full))

    outs = pl.pallas_call(
        kernel,
        out_shape=tuple(out_shapes),
        grid=(mp // tm,),
        in_specs=in_specs,
        out_specs=tuple(out_specs),
        compiler_params=_compiler_params(),
    )(*(row_args + consts))
    return {nm: o[:m] for nm, o in zip(out_names, outs)}


# ----------------------------------------------------------------------------
# kernel: fused TemporalLogicMachineDPV2 (3 suffix max/min depths) +
#         max-over-time + decoder.  h streamed from the input block,
#         per-step in-place writes into one VMEM scratch, no full-slab values.
# ----------------------------------------------------------------------------
def _tlm_decoder_kernel(h_ref, wx0, wmax0, wmin0, bb0, wx1, wmax1, wmin1, bb1,
                        wx2, wmax2, wmin2, bb2, wd, bd, o_ref, buf_ref, *, L, F):
    # TODO(synk): for production length (L~1000) switch the unrolled time scan to
    #             lax.fori_loop and stream time chunks from HBM (pl.ANY + manual DMA).
    dparams = ((wx0, wmax0, wmin0, bb0),
               (wx1, wmax1, wmin1, bb1),
               (wx2, wmax2, wmin2, bb2))
    feat = None
    for d in range(3):
        wx = dparams[d][0][...]
        wmax = dparams[d][1][...]
        wmin = dparams[d][2][...]
        bb = dparams[d][3][...]
        src = h_ref if d == 0 else buf_ref
        run_max = None
        run_min = None
        for t in range(L - 1, -1, -1):           # suffix (future) pooling
            xt = src[:, t * F:(t + 1) * F]
            run_max = xt if run_max is None else jnp.maximum(run_max, xt)
            run_min = xt if run_min is None else jnp.minimum(run_min, xt)
            z = (jnp.dot(xt.astype(jnp.bfloat16), wx, preferred_element_type=jnp.float32)
                 + jnp.dot(run_max.astype(jnp.bfloat16), wmax, preferred_element_type=jnp.float32)
                 + jnp.dot(run_min.astype(jnp.bfloat16), wmin, preferred_element_type=jnp.float32)
                 + bb)
            ht = jax.nn.sigmoid(z)
            if d < 2:
                # in-place is safe: slice t is never re-read at this depth
                buf_ref[:, t * F:(t + 1) * F] = ht
            else:
                feat = ht if feat is None else jnp.maximum(feat, ht)   # max over time
    out = jnp.dot(feat.astype(jnp.bfloat16), wd[...],
                  preferred_element_type=jnp.float32) + bd[...]
    o_ref[...] = out.astype(o_ref.dtype)


def _tlm_row_tile(b, L, F):
    # Budget the row tile from L*F: 2x pipelined (tb, L*F) input block + one
    # in-place scratch of the same size must fit the (v7x-safe) VMEM limit.
    budget = int(_vmem_limit_bytes() * 0.55)
    per_row = 3 * L * F * 4
    tb = max(8, min(256, (budget // max(per_row, 1)) // 8 * 8))
    b8 = _round_up(max(b, 1), 8)
    tb = min(tb, b8)
    if b8 > 8 and tb >= b8:           # keep >=2 grid steps for v7x's 2 TensorCores
        tb = max(8, _round_up(-(-b8 // 2), 8))
    return tb


def pallas_tlm_decoder(params, feat2d, L, F, n_actions):
    """feat2d: [B, L*F]  ->  decoder output [B, dec_out]."""
    b = feat2d.shape[0]
    assert feat2d.shape[1] == L * F
    dec_out = 1 if n_actions == 2 else n_actions

    ck = ('tlm_consts', L, F, dec_out)
    if ck not in params:
        consts = []
        for d in range(3):
            w, bia = _get_linear(params, f'tlm{d}', 3 * F, F)
            consts += [_bf16(w[:F]), _bf16(w[F:2 * F]), _bf16(w[2 * F:]), bia]
        wd, bd = _get_linear(params, 'decoder', F, dec_out)
        consts += [_bf16(wd), bd]
        params[ck] = consts
    consts = params[ck]

    tb = _tlm_row_tile(b, L, F)
    bp = _round_up(b, tb)
    h = _pad_rows(feat2d, bp)
    kernel = functools.partial(_tlm_decoder_kernel, L=L, F=F)
    out = pl.pallas_call(
        kernel,
        out_shape=jax.ShapeDtypeStruct((bp, dec_out), jnp.float32),
        grid=(bp // tb,),
        in_specs=[pl.BlockSpec((tb, L * F), lambda i: (i, 0))]
                 + [pl.BlockSpec(a.shape, lambda i: (0, 0)) for a in consts],
        out_specs=pl.BlockSpec((tb, dec_out), lambda i: (i, 0)),
        scratch_shapes=[pltpu.VMEM((tb, L * F), jnp.float32)],
        compiler_params=_compiler_params(),
    )(h, *consts)
    return out[:b]


# ----------------------------------------------------------------------------
# NLTL_RLv3 forward
# ----------------------------------------------------------------------------
def _needed_groups(layer, depth):
    # Only the groups that can influence the final nullary output are computed:
    # last layer -> {0}, previous -> {0,1}, earlier layers -> {0,1,2}.
    # Pure dead-code elimination; the forward output is unchanged.
    remaining = depth - 1 - layer
    return tuple(range(min(3, remaining + 1)))


def nltl_rlv3_forward(params, data, hp, config):
    nullary = jnp.asarray(data['nullary_states'], jnp.float32)   # [B, L, d0]
    unary = jnp.asarray(data['unary_states'], jnp.float32)       # [B, L, N, du]
    actions = data['actions']                                    # [B]
    B, L, N, Du = unary.shape
    beta = float(hp.get('beta', 1.0))
    BL = B * L
    depth = int(config['depth'])
    permute = bool(config['logic_layer_permute'])

    # TODO(synk): logic_hidden_dim MLP hidden layers are not implemented (the
    #             example config uses []); each NLM group is Linear+sigmoid.
    w_it, b_it = _get_linear(params, 'input_transform', Du, 64)

    f0_slabs = [nullary.reshape(BL, nullary.shape[-1])]   # special nullary states
    f1_slabs, f2_slabs = [], []
    unary_slab = unary.reshape(BL, N * Du)

    f0_full = None
    for layer in range(depth):
        od = int(config['logic_output_dims'][layer])
        groups = _needed_groups(layer, depth)
        last = layer == depth - 1
        fuse = (dict(unary=unary_slab, w=w_it, b=b_it, beta=beta, out=64)
                if layer == 0 else None)
        outs = pallas_nlm_layer(params, f'nlm{layer}', f0_slabs, f1_slabs, f2_slabs,
                                n=N, od=od, permute=permute, groups=groups,
                                fuse_it=fuse, emit_f0_full=last)
        if fuse is not None:
            f1_slabs = [outs['f1p']]          # layer-0 input-transform predicates
        if last:
            f0_full = outs['o0']              # [BL, d0_total] full nullary feature
        else:
            f0_slabs = f0_slabs + [outs['o0']]
            if 'o1' in outs:
                f1_slabs = f1_slabs + [outs['o1']]
            if 'o2' in outs:
                f2_slabs = f2_slabs + [outs['o2']]

    # ---- TemporalLogicMachineDPV2 (suffix pooling) + max-over-time + decoder
    F = f0_full.shape[1]
    feat2d = f0_full.reshape(B, L * F)        # free row-major reshape
    output = pallas_tlm_decoder(params, feat2d, L, F, int(config['n_actions']))
    if int(config['n_actions']) == 2:
        output = jnp.concatenate([-output, output], axis=1)

    # L1(decoder.weight, 0) * 0.0  ->  exact zeros of shape [batch]
    model_loss = jnp.zeros((B,), jnp.float32)
    return {'output': output, 'target': actions, 'loss': model_loss}


# ----------------------------------------------------------------------------
if __name__ == "__main__":
    config = {
        'name': 'NLTL_RLv3',
        'length': 8,
        'state_dim': [8, 8],
        'object_name_dim': 8,
        'n_actions': 5,
        'input_transform': 'nn',
        'input_transform_h_dim': [],
        'depth': 3,
        'logic_output_dims': [16, 16, 16],
        'logic_hidden_dim': [],
        'logic_layer_permute': True,
    }
    B, L, N = 2, config['length'], 4
    d0 = config['state_dim'][0]
    du = config['state_dim'][1] + config['object_name_dim']

    key = jax.random.PRNGKey(0)
    k1, k2, k3 = jax.random.split(key, 3)
    data = {
        'nullary_states': jax.random.uniform(k1, (B, L, d0), jnp.float32),
        'unary_states': jax.random.normal(k2, (B, L, N, du), jnp.float32),
        'actions': jax.random.randint(k3, (B,), 0, config['n_actions']),
    }
    hp = {'beta': 2.0}

    params = {}
    out = nltl_rlv3_forward(params, data, hp, config)
    jax.block_until_ready(out['output'])
    jax.block_until_ready(out['loss'])
    assert out['output'].shape == (B, config['n_actions'])
    assert out['loss'].shape == (B,)
    assert bool(jnp.all(jnp.isfinite(out['output'])))
    print("KERNEL_OK")
</pallas_src>

<mosaic_0001>
module attributes {stable_mosaic.version = 11 : i64} {
  func.func @_nlm_layer_kernel(%arg0: i32, %arg1: memref<8x8xf32, #tpu.memory_space<vmem>>, %arg2: memref<8x64xf32, #tpu.memory_space<vmem>>, %arg3: memref<64x256xbf16, #tpu.memory_space<vmem>>, %arg4: memref<1x256xf32, #tpu.memory_space<vmem>>, %arg5: memref<8x16xbf16, #tpu.memory_space<vmem>>, %arg6: memref<64x16xbf16, #tpu.memory_space<vmem>>, %arg7: memref<64x16xbf16, #tpu.memory_space<vmem>>, %arg8: memref<1x16xf32, #tpu.memory_space<vmem>>, %arg9: memref<8x64xbf16, #tpu.memory_space<vmem>>, %arg10: memref<256x64xbf16, #tpu.memory_space<vmem>>, %arg11: memref<1x64xf32, #tpu.memory_space<vmem>>, %arg12: memref<256x256xbf16, #tpu.memory_space<vmem>>, %arg13: memref<1x256xf32, #tpu.memory_space<vmem>>, %arg14: memref<8x256xf32, #tpu.memory_space<vmem>>, %arg15: memref<8x16xf32, #tpu.memory_space<vmem>>, %arg16: memref<8x64xf32, #tpu.memory_space<vmem>>, %arg17: memref<8x256xf32, #tpu.memory_space<vmem>>) attributes {dimension_semantics = [#tpu.dimension_semantics<parallel>], iteration_bounds = array<i64: 2>, scalar_prefetch = 0 : i64, scratch_operands = 0 : i64, tpu.core_type = #tpu.core_type<tc>, window_params = [{transform_indices = @transform_0, window_bounds = array<i64: 8, 8>}, {transform_indices = @transform_1, window_bounds = array<i64: 8, 64>}, {pipeline_mode = #tpu.pipeline_mode<synchronous>, transform_indices = @transform_2, window_bounds = array<i64: 64, 256>}, {pipeline_mode = #tpu.pipeline_mode<synchronous>, transform_indices = @transform_3, window_bounds = array<i64: 1, 256>}, {pipeline_mode = #tpu.pipeline_mode<synchronous>, transform_indices = @transform_4, window_bounds = array<i64: 8, 16>}, {pipeline_mode = #tpu.pipeline_mode<synchronous>, transform_indices = @transform_5, window_bounds = array<i64: 64, 16>}, {pipeline_mode = #tpu.pipeline_mode<synchronous>, transform_indices = @transform_6, window_bounds = array<i64: 64, 16>}, {pipeline_mode = #tpu.pipeline_mode<synchronous>, transform_indices = @transform_7, window_bounds = array<i64: 1, 16>}, {pipeline_mode = #tpu.pipeline_mode<synchronous>, transform_indices = @transform_8, window_bounds = array<i64: 8, 64>}, {pipeline_mode = #tpu.pipeline_mode<synchronous>, transform_indices = @transform_9, window_bounds = array<i64: 256, 64>}, {pipeline_mode = #tpu.pipeline_mode<synchronous>, transform_indices = @transform_10, window_bounds = array<i64: 1, 64>}, {pipeline_mode = #tpu.pipeline_mode<synchronous>, transform_indices = @transform_11, window_bounds = array<i64: 256, 256>}, {pipeline_mode = #tpu.pipeline_mode<synchronous>, transform_indices = @transform_12, window_bounds = array<i64: 1, 256>}, {transform_indices = @transform_13, window_bounds = array<i64: 8, 256>}, {transform_indices = @transform_14, window_bounds = array<i64: 8, 16>}, {transform_indices = @transform_15, window_bounds = array<i64: 8, 64>}, {transform_indices = @transform_16, window_bounds = array<i64: 8, 256>}]} {
    %c0 = arith.constant 0 : index
    %c0_0 = arith.constant 0 : index
    %0 = vector.load %arg2[%c0, %c0_0] : memref<8x64xf32, #tpu.memory_space<vmem>>, vector<8x64xf32>
    %1 = arith.truncf %0 : vector<8x64xf32> to vector<8x64xbf16>
    %c0_1 = arith.constant 0 : index
    %c0_2 = arith.constant 0 : index
    %2 = vector.load %arg3[%c0_1, %c0_2] : memref<64x256xbf16, #tpu.memory_space<vmem>>, vector<64x256xbf16>
    %cst = arith.constant dense<0.000000e+00> : vector<8x256xf32>
    %3 = tpu.matmul %1, %2, %cst {dimension_numbers = #tpu.dot_dimension_numbers<[1], [0], [0], [1], [0, 0, 1, 1], [], []>} : vector<8x64xbf16>, vector<64x256xbf16>, vector<8x256xf32> -> vector<8x256xf32>
    %c0_3 = arith.constant 0 : index
    %c0_4 = arith.constant 0 : index
    %4 = vector.load %arg4[%c0_3, %c0_4] : memref<1x256xf32, #tpu.memory_space<vmem>>, vector<1x256xf32>
    %5 = vector.broadcast %4 : vector<1x256xf32> to vector<8x256xf32>
    %6 = arith.addf %3, %5 : vector<8x256xf32>
    %cst_5 = arith.constant 2.000000e+00 : f32
    %7 = vector.broadcast %cst_5 : f32 to vector<8x256xf32>
    %8 = arith.mulf %7, %6 : vector<8x256xf32>
    %9 = arith.negf %8 : vector<8x256xf32>
    %10 = math.exp %9 : vector<8x256xf32>
    %cst_6 = arith.constant 1.000000e+00 : f32
    %11 = vector.broadcast %cst_6 : f32 to vector<8x256xf32>
    %12 = arith.addf %11, %10 : vector<8x256xf32>
    %13 = arith.divf %11, %12 : vector<8x256xf32>
    %c0_7 = arith.constant 0 : index
    %c0_8 = arith.constant 0 : index
    %14 = vector.load %arg14[%c0_7, %c0_8] : memref<8x256xf32, #tpu.memory_space<vmem>>, vector<8x256xf32>
    tpu.vector_store %arg14[%c0_7, %c0_8], %13 {strides = array<i32>} : memref<8x256xf32, #tpu.memory_space<vmem>>, vector<8x256xf32>,
    %c0_9 = arith.constant 0 : index
    %c0_10 = arith.constant 0 : index
    %15 = vector.load %arg1[%c0_9, %c0_10] : memref<8x8xf32, #tpu.memory_space<vmem>>, vector<8x8xf32>
    %c0_11 = arith.constant 0 : index
    %c0_12 = arith.constant 0 : index
    %16 = vector.load %arg8[%c0_11, %c0_12] : memref<1x16xf32, #tpu.memory_space<vmem>>, vector<1x16xf32>
    %17 = arith.truncf %15 : vector<8x8xf32> to vector<8x8xbf16>
    %c0_13 = arith.constant 0 : index
    %c0_14 = arith.constant 0 : index
    %18 = vector.load %arg5[%c0_13, %c0_14] : memref<8x16xbf16, #tpu.memory_space<vmem>>, vector<8x16xbf16>
    %cst_15 = arith.constant dense<0.000000e+00> : vector<8x16xf32>
    %19 = tpu.matmul %17, %18, %cst_15 {dimension_numbers = #tpu.dot_dimension_numbers<[1], [0], [0], [1], [0, 0, 1, 1], [], []>} : vector<8x8xbf16>, vector<8x16xbf16>, vector<8x16xf32> -> vector<8x16xf32>
    %20 = vector.broadcast %16 : vector<1x16xf32> to vector<8x16xf32>
    %21 = arith.addf %20, %19 : vector<8x16xf32>
    %c0_16 = arith.constant 0 : index
    %c0_17 = arith.constant 0 : index
    %22 = vector.load %arg14[%c0_16, %c0_17] : memref<8x256xf32, #tpu.memory_space<vmem>>, vector<8x64xf32>
    %c0_18 = arith.constant 0 : index
    %c64 = arith.constant 64 : index
    %23 = vector.load %arg14[%c0_18, %c64] : memref<8x256xf32, #tpu.memory_space<vmem>>, vector<8x64xf32>
    %24 = arith.maximumf %22, %23 : vector<8x64xf32>
    %25 = arith.minimumf %22, %23 : vector<8x64xf32>
    %c0_19 = arith.constant 0 : index
    %c128 = arith.constant 128 : index
    %26 = vector.load %arg14[%c0_19, %c128] : memref<8x256xf32, #tpu.memory_space<vmem>>, vector<8x64xf32>
    %27 = arith.maximumf %24, %26 : vector<8x64xf32>
    %28 = arith.minimumf %25, %26 : vector<8x64xf32>
    %c0_20 = arith.constant 0 : index
    %c192 = arith.constant 192 : index
    %29 = vector.load %arg14[%c0_20, %c192] : memref<8x256xf32, #tpu.memory_space<vmem>>, vector<8x64xf32>
    %30 = arith.maximumf %27, %29 : vector<8x64xf32>
    %31 = arith.minimumf %28, %29 : vector<8x64xf32>
    %32 = arith.truncf %30 : vector<8x64xf32> to vector<8x64xbf16>
    %c0_21 = arith.constant 0 : index
    %c0_22 = arith.constant 0 : index
    %33 = vector.load %arg6[%c0_21, %c0_22] : memref<64x16xbf16, #tpu.memory_space<vmem>>, vector<64x16xbf16>
    %cst_23 = arith.constant dense<0.000000e+00> : vector<8x16xf32>
    %34 = tpu.matmul %32, %33, %cst_23 {dimension_numbers = #tpu.dot_dimension_numbers<[1], [0], [0], [1], [0, 0, 1, 1], [], []>} : vector<8x64xbf16>, vector<64x16xbf16>, vector<8x16xf32> -> vector<8x16xf32>
    %35 = arith.addf %21, %34 : vector<8x16xf32>
    %36 = arith.truncf %31 : vector<8x64xf32> to vector<8x64xbf16>
    %c0_24 = arith.constant 0 : index
    %c0_25 = arith.constant 0 : index
    %37 = vector.load %arg7[%c0_24, %c0_25] : memref<64x16xbf16, #tpu.memory_space<vmem>>, vector<64x16xbf16>
    %cst_26 = arith.constant dense<0.000000e+00> : vector<8x16xf32>
    %38 = tpu.matmul %36, %37, %cst_26 {dimension_numbers = #tpu.dot_dimension_numbers<[1], [0], [0], [1], [0, 0, 1, 1], [], []>} : vector<8x64xbf16>, vector<64x16xbf16>, vector<8x16xf32> -> vector<8x16xf32>
    %39 = arith.addf %35, %38 : vector<8x16xf32>
    %40 = arith.negf %39 : vector<8x16xf32>
    %41 = math.exp %40 : vector<8x16xf32>
    %cst_27 = arith.constant 1.000000e+00 : f32
    %42 = vector.broadcast %cst_27 : f32 to vector<8x16xf32>
    %43 = arith.addf %42, %41 : vector<8x16xf32>
    %44 = arith.divf %42, %43 : vector<8x16xf32>
    %c0_28 = arith.constant 0 : index
    %c0_29 = arith.constant 0 : index
    %45 = vector.load %arg15[%c0_28, %c0_29] : memref<8x16xf32, #tpu.memory_space<vmem>>, vector<8x16xf32>
    tpu.vector_store %arg15[%c0_28, %c0_29], %44 {strides = array<i32>} : memref<8x16xf32, #tpu.memory_space<vmem>>, vector<8x16xf32>,
    %c0_30 = arith.constant 0 : index
    %c0_31 = arith.constant 0 : index
    %46 = vector.load %arg11[%c0_30, %c0_31] : memref<1x64xf32, #tpu.memory_space<vmem>>, vector<1x64xf32>
    %47 = arith.truncf %15 : vector<8x8xf32> to vector<8x8xbf16>
    %c0_32 = arith.constant 0 : index
    %c0_33 = arith.constant 0 : index
    %48 = vector.load %arg9[%c0_32, %c0_33] : memref<8x64xbf16, #tpu.memory_space<vmem>>, vector<8x64xbf16>
    %cst_34 = arith.constant dense<0.000000e+00> : vector<8x64xf32>
    %49 = tpu.matmul %47, %48, %cst_34 {dimension_numbers = #tpu.dot_dimension_numbers<[1], [0], [0], [1], [0, 0, 1, 1], [], []>} : vector<8x8xbf16>, vector<8x64xbf16>, vector<8x64xf32> -> vector<8x64xf32>
    %50 = vector.broadcast %46 : vector<1x64xf32> to vector<8x64xf32>
    %51 = arith.addf %50, %49 : vector<8x64xf32>
    %c0_35 = arith.constant 0 : index
    %c0_36 = arith.constant 0 : index
    %52 = vector.load %arg14[%c0_35, %c0_36] : memref<8x256xf32, #tpu.memory_space<vmem>>, vector<8x256xf32>
    %53 = arith.truncf %52 : vector<8x256xf32> to vector<8x256xbf16>
    %c0_37 = arith.constant 0 : index
    %c0_38 = arith.constant 0 : index
    %54 = vector.load %arg10[%c0_37, %c0_38] : memref<256x64xbf16, #tpu.memory_space<vmem>>, vector<256x64xbf16>
    %cst_39 = arith.constant dense<0.000000e+00> : vector<8x64xf32>
    %55 = tpu.matmul %53, %54, %cst_39 {dimension_numbers = #tpu.dot_dimension_numbers<[1], [0], [0], [1], [0, 0, 1, 1], [], []>} : vector<8x256xbf16>, vector<256x64xbf16>, vector<8x64xf32> -> vector<8x64xf32>
    %56 = arith.addf %51, %55 : vector<8x64xf32>
    %57 = arith.negf %56 : vector<8x64xf32>
    %58 = math.exp %57 : vector<8x64xf32>
    %cst_40 = arith.constant 1.000000e+00 : f32
    %59 = vector.broadcast %cst_40 : f32 to vector<8x64xf32>
    %60 = arith.addf %59, %58 : vector<8x64xf32>
    %61 = arith.divf %59, %60 : vector<8x64xf32>
    %c0_41 = arith.constant 0 : index
    %c0_42 = arith.constant 0 : index
    %62 = vector.load %arg16[%c0_41, %c0_42] : memref<8x64xf32, #tpu.memory_space<vmem>>, vector<8x64xf32>
    tpu.vector_store %arg16[%c0_41, %c0_42], %61 {strides = array<i32>} : memref<8x64xf32, #tpu.memory_space<vmem>>, vector<8x64xf32>,
    %c0_43 = arith.constant 0 : index
    %c0_44 = arith.constant 0 : index
    %63 = vector.load %arg13[%c0_43, %c0_44] : memref<1x256xf32, #tpu.memory_space<vmem>>, vector<1x256xf32>
    %c0_45 = arith.constant 0 : index
    %c0_46 = arith.constant 0 : index
    %64 = vector.load %arg14[%c0_45, %c0_46] : memref<8x256xf32, #tpu.memory_space<vmem>>, vector<8x256xf32>
    %65 = arith.truncf %64 : vector<8x256xf32> to vector<8x256xbf16>
    %c0_47 = arith.constant 0 : index
    %c0_48 = arith.constant 0 : index
    %66 = vector.load %arg12[%c0_47, %c0_48] : memref<256x256xbf16, #tpu.memory_space<vmem>>, vector<256x256xbf16>
    %cst_49 = arith.constant dense<0.000000e+00> : vector<8x256xf32>
    %67 = tpu.matmul %65, %66, %cst_49 {dimension_numbers = #tpu.dot_dimension_numbers<[1], [0], [0], [1], [0, 0, 1, 1], [], []>} : vector<8x256xbf16>, vector<256x256xbf16>, vector<8x256xf32> -> vector<8x256xf32>
    %68 = vector.broadcast %63 : vector<1x256xf32> to vector<8x256xf32>
    %69 = arith.addf %68, %67 : vector<8x256xf32>
    %70 = arith.negf %69 : vector<8x256xf32>
    %71 = math.exp %70 : vector<8x256xf32>
    %cst_50 = arith.constant 1.000000e+00 : f32
    %72 = vector.broadcast %cst_50 : f32 to vector<8x256xf32>
    %73 = arith.addf %72, %71 : vector<8x256xf32>
    %74 = arith.divf %72, %73 : vector<8x256xf32>
    %c0_51 = arith.constant 0 : index
    %c0_52 = arith.constant 0 : index
    %75 = vector.load %arg17[%c0_51, %c0_52] : memref<8x256xf32, #tpu.memory_space<vmem>>, vector<8x256xf32>
    tpu.vector_store %arg17[%c0_51, %c0_52], %74 {strides = array<i32>} : memref<8x256xf32, #tpu.memory_space<vmem>>, vector<8x256xf32>,
    return
  }
  func.func @transform_0(%arg0: i32) -> (i32, i32) {
    %c0_i32 = arith.constant 0 : i32
    %c0_i32_0 = arith.constant 0 : i32
    return %arg0, %c0_i32 : i32, i32
  }
  func.func @transform_1(%arg0: i32) -> (i32, i32) {
    %c0_i32 = arith.constant 0 : i32
    %c0_i32_0 = arith.constant 0 : i32
    return %arg0, %c0_i32 : i32, i32
  }
  func.func @transform_2(%arg0: i32) -> (i32, i32) {
    %c0_i32 = arith.constant 0 : i32
    %c0_i32_0 = arith.constant 0 : i32
    %c0_i32_1 = arith.constant 0 : i32
    return %c0_i32, %c0_i32_0 : i32, i32
  }
  func.func @transform_3(%arg0: i32) -> (i32, i32) {
    %c0_i32 = arith.constant 0 : i32
    %c0_i32_0 = arith.constant 0 : i32
    %c0_i32_1 = arith.constant 0 : i32
    return %c0_i32, %c0_i32_0 : i32, i32
  }
  func.func @transform_4(%arg0: i32) -> (i32, i32) {
    %c0_i32 = arith.constant 0 : i32
    %c0_i32_0 = arith.constant 0 : i32
    %c0_i32_1 = arith.constant 0 : i32
    return %c0_i32, %c0_i32_0 : i32, i32
  }
  func.func @transform_5(%arg0: i32) -> (i32, i32) {
    %c0_i32 = arith.constant 0 : i32
    %c0_i32_0 = arith.constant 0 : i32
    %c0_i32_1 = arith.constant 0 : i32
    return %c0_i32, %c0_i32_0 : i32, i32
  }
  func.func @transform_6(%arg0: i32) -> (i32, i32) {
    %c0_i32 = arith.constant 0 : i32
    %c0_i32_0 = arith.constant 0 : i32
    %c0_i32_1 = arith.constant 0 : i32
    return %c0_i32, %c0_i32_0 : i32, i32
  }
  func.func @transform_7(%arg0: i32) -> (i32, i32) {
    %c0_i32 = arith.constant 0 : i32
    %c0_i32_0 = arith.constant 0 : i32
    %c0_i32_1 = arith.constant 0 : i32
    return %c0_i32, %c0_i32_0 : i32, i32
  }
  func.func @transform_8(%arg0: i32) -> (i32, i32) {
    %c0_i32 = arith.constant 0 : i32
    %c0_i32_0 = arith.constant 0 : i32
    %c0_i32_1 = arith.constant 0 : i32
    return %c0_i32, %c0_i32_0 : i32, i32
  }
  func.func @transform_9(%arg0: i32) -> (i32, i32) {
    %c0_i32 = arith.constant 0 : i32
    %c0_i32_0 = arith.constant 0 : i32
    %c0_i32_1 = arith.constant 0 : i32
    return %c0_i32, %c0_i32_0 : i32, i32
  }
  func.func @transform_10(%arg0: i32) -> (i32, i32) {
    %c0_i32 = arith.constant 0 : i32
    %c0_i32_0 = arith.constant 0 : i32
    %c0_i32_1 = arith.constant 0 : i32
    return %c0_i32, %c0_i32_0 : i32, i32
  }
  func.func @transform_11(%arg0: i32) -> (i32, i32) {
    %c0_i32 = arith.constant 0 : i32
    %c0_i32_0 = arith.constant 0 : i32
    %c0_i32_1 = arith.constant 0 : i32
    return %c0_i32, %c0_i32_0 : i32, i32
  }
  func.func @transform_12(%arg0: i32) -> (i32, i32) {
    %c0_i32 = arith.constant 0 : i32
    %c0_i32_0 = arith.constant 0 : i32
    %c0_i32_1 = arith.constant 0 : i32
    return %c0_i32, %c0_i32_0 : i32, i32
  }
  func.func @transform_13(%arg0: i32) -> (i32, i32) {
    %c0_i32 = arith.constant 0 : i32
    %c0_i32_0 = arith.constant 0 : i32
    return %arg0, %c0_i32 : i32, i32
  }
  func.func @transform_14(%arg0: i32) -> (i32, i32) {
    %c0_i32 = arith.constant 0 : i32
    %c0_i32_0 = arith.constant 0 : i32
    return %arg0, %c0_i32 : i32, i32
  }
  func.func @transform_15(%arg0: i32) -> (i32, i32) {
    %c0_i32 = arith.constant 0 : i32
    %c0_i32_0 = arith.constant 0 : i32
    return %arg0, %c0_i32 : i32, i32
  }
  func.func @transform_16(%arg0: i32) -> (i32, i32) {
    %c0_i32 = arith.constant 0 : i32
    %c0_i32_0 = arith.constant 0 : i32
    return %arg0, %c0_i32 : i32, i32
  }
}

</mosaic_0001>

<bundles_post_ra>
// kernel: tpu_custom_call.1
= control target key start
LH: loop header
LB: loop body
LE: loop exit
PB: predicated region body
PF: predicated region fallthrough
CT: control target
= control target key end

     0   :  { %s3102_s0 = inlined_call_operand.vmem [shape: f32[16,8], index: 0, kind: input, shape index: {}]   ;;  %s3103_s1 = inlined_call_operand.vmem [shape: f32[16,64], index: 1, kind: input, shape index: {}]   ;;  %s3104_s2 = inlined_call_operand.vmem [shape: bf16[64,256], index: 2, kind: input, shape index: {}]   ;;  %s3105_s3 = inlined_call_operand.hbm [shape: f32[1,256], index: 3, kind: input, shape index: {}]   ;;  %s3106_s4 = inlined_call_operand.hbm [shape: bf16[8,16], index: 4, kind: input, shape index: {}]   ;;  %s3107_s5 = inlined_call_operand.vmem [shape: bf16[64,16], index: 5, kind: input, shape index: {}]   ;;  %s3108_s6 = inlined_call_operand.vmem [shape: bf16[64,16], index: 6, kind: input, shape index: {}]   ;;  %s3109_s7 = inlined_call_operand.vmem [shape: f32[1,16], index: 7, kind: input, shape index: {}]   ;;  %s3110_s8 = inlined_call_operand.hbm [shape: bf16[8,64], index: 8, kind: input, shape index: {}]   ;;  %s3111_s9 = inlined_call_operand.vmem [shape: bf16[256,64], index: 9, kind: input, shape index: {}]   ;;  %s3112_s10 = inlined_call_operand.hbm [shape: f32[1,64], index: 10, kind: input, shape index: {}]   ;;  %s3113_s11 = inlined_call_operand.vmem [shape: bf16[256,256], index: 11, kind: input, shape index: {}]   ;;  %s3114_s12 = inlined_call_operand.vmem [shape: f32[1,256], index: 12, kind: input, shape index: {}]   ;;  %s3115_s13 = inlined_call_operand.hbm [shape: f32[16,256], index: 13, kind: output, shape index: {0}]   ;;  %s3116_s14 = inlined_call_operand.hbm [shape: f32[16,16], index: 14, kind: output, shape index: {1}]   ;;  %s3117_s15 = inlined_call_operand.hbm [shape: f32[16,64], index: 15, kind: output, shape index: {2}]   ;;  %s3118_s16 = inlined_call_operand.hbm [shape: f32[16,256], index: 16, kind: output, shape index: {3}]  }
   0x1   :  { %3133 = sst [smem:[#allocation28_spill]] %s3102_s0 }
   0x2   :  { %3134 = sst [smem:[#allocation29_spill]] %s3114_s12 }
   0x3   :  { %3135 = sst [smem:[#allocation30_spill]] %s3117_s15 }
   0x4   :  { %3136 = sst [smem:[#allocation31_spill]] %s3118_s16 }
   0x5   :  { %22 = vsyncpa [#allocation3], 0 }
   0x6   :  { %23 = vsyncpa [#allocation6], 0 }
   0x7   :  { %24 = vsyncpa [#allocation9], 0 }
   0x8   :  { %25 = vsyncpa [#allocation4], 0 }
   0x9   :  { %27 = vsyncpa [#allocation4 + $0x1], 0 }
   0xa   :  { %28 = vsyncpa [#allocation12], 0 }
   0xb   :  { %30 = vsyncpa [#allocation12 + $0x1], 0 }
   0xc   :  { %31 = vsyncpa [#allocation15], 0 }
   0xd   :  { %33 = vsyncpa [#allocation15 + $0x1], 0  ;;  %s2517_s21 = smov 0   ;;  %s2519_s22 = smov 0  }
   0xe   :  { %s2521_s23 = smov 0   ;;  %s2523_s24 = smov 0  }
   0xf LB: > { %3137 = sst [smem:[#allocation22_spill]] %s2406_s21  ;;  %s2538_s25 = sadd.s32 4294967295, %s2418_s24   ;;  %s2418_s24 = sphi %s2523_s24, %s3166_s24   ;;  %s2414_s23 = sphi %s2521_s23, %s3168_s23   ;;  %s2410_s22 = sphi %s2519_s22, %s3170_s22   ;;  %s2406_s21 = sphi %s2517_s21, %s3169_s21  }
  0x10   : > { %3138 = sst [smem:[#allocation23_spill]] %s2414_s23  ;;  %s3119_s26 = sadd.s32 4294967294, %s2418_s24  }
  0x11   : > { %3139 = sst [smem:[#allocation24_spill]] %s2418_s24  ;;  %s2542_s27 = sadd.s32 1, %s2418_s24  }
  0x12   : > { %3140 = sst [smem:[#allocation25_spill]] %s2542_s27  ;;  %s329_s28 = sadd.s32 1, %s2414_s23 }
  0x13   : > { %s326_s29 = ssub.s32 %s2418_s24, %s2542_s27  ;;  %p339_p0 = scmp.ne.s32.totalorder %s2414_s23, %s2410_s22 }
  0x14   : > { %p327_p1 = scmp.eq.s32.totalorder %s326_s29, 0  ;;  %p340_p2 = scmp.eq.s32.totalorder %s2538_s25, 1 }
  0x15   : > { %p345_p3 = scmp.ne.s32.totalorder %s2410_s22, %s2406_s21  ;;  %p346_p4 = scmp.eq.s32.totalorder %s3119_s26, 1 }
  0x16   : > { %s2555_s30 = scalar_select %p327_p1, %s2414_s23, %s329_s28  }
  0x17   : > { %p2557_p5 = por %p340_p2, %p339_p0  ;;  %p2561_p6 = por %p346_p4, %p345_p3 }
  0x18   : > { %3141 = sst [smem:[#allocation26_spill]] %s2555_s30  ;;  %p1747_p7 = scmp.ge.s32.totalorder %s2418_s24, 1 }
  0x19   : > { %s3142_s0 = scalar_select %p2557_p5, 1, 0 }
  0x1a   : > { %s3143_s17 = scalar_select %p2561_p6, 1, 0 }
  0x1b   : > { %p431_p8 = scmp.lt.s32.totalorder %s2418_s24, 3  ;;  %p3128_p9 = scmp.eq.s32.totalorder %s2538_s25, 0 }
  0x1c   : > { %3144 = sst [smem:[#allocation27_spill]] %s3143_s17  ;;  %s2420_s19 = smov [#allocation5]  }
  0x1d   : > { %p2568_p10 = pnand %p1747_p7, %p431_p8  ;;  %s458_s20 = sshll.u32 %s2420_s19, 4  ;;  %s459_s20 = int_to_ptr.vmem [resolvable:$true] %s458_s20 }
  0x1e   : > { %s2421_s28 = smov [#allocation2]   ;;  %s2422_s30 = smov [#allocation7]  }
  0x1f   : > { %s3145_s18 = scalar_select %p2568_p10, 1, 0 }
  0x20   : > { %p1957_p11 = pneg %p2568_p10  ;;  %s447_s29 = sshll.u32 %s2421_s28, 4  ;;  %s2580_s29 = int_to_ptr.vmem [resolvable:$true] %s447_s29 }
  0x21   : > { %s478_s23 = sshll.u32 %s2422_s30, 4  ;;  %s2140_s19 = scalar_lea.hbm %s3106_s4, 64  ;;  %s2582_s23 = int_to_ptr.vmem [resolvable:$true] %s478_s23 }
  0x22   : > { %p2576_p12 = pnand %p3128_p9, %p1957_p11  ;;  %p2141_p13 = scmp.ne.s32.totalorder %s3106_s4, %s2140_s19 }
  0x23   : > { %p2147_p3 = scmp.lt.u32.totalorder %s2140_s19, %s3106_s4 }
  0x24   : > { %p2592_p0 = pneg %p2576_p12 }
  0x26   : > { %p2143_p1 = pnand %p2592_p0, %p2141_p13 }
  0x28   : > { %p2144_p2 = pneg %p2143_p1 }
  0x2a   : > { %p2149_p4 = pnand %p2147_p3, %p2144_p2 }
  0x2c   : > { %2152 = shalt.err (!%p2149_p4)
}
  0x2d   : > { %s2153_s27 = scalar_lea.vmem %s459_s20, 64  ;;  %p2161_p9 = scmp.lt.s32.totalorder %s459_s20, %s459_s20 }
  0x2e   : > { %p2154_p7 = scmp.ne.s32.totalorder %s459_s20, %s2153_s27  ;;  %p2162_p6 = scmp.lt.s32.totalorder %s2153_s27, %s2153_s27 }
  0x30   : > { %p2156_p8 = pnand %p2154_p7, %p2592_p0  ;;  %p2163_p5 = por %p2162_p6, %p2161_p9 }
  0x32   : > { %p2157_p11 = pneg %p2156_p8 }
  0x34   : > { %p2164_p10 = pnand %p2163_p5, %p2157_p11 }
  0x36   : > { %2167 = shalt.err (!%p2164_p10)
}
  0x37   : > { %1963 = dma.hbm_to_vmem [thread:$0]  (!%p2576_p12), %s3106_s4, 64, %s459_s20, [#allocation6]  }
  0x38   : > { %s2168_s19 = scalar_lea.hbm %s3105_s3, 32 }
  0x39   : > { %p2169_p13 = scmp.ne.s32.totalorder %s3105_s3, %s2168_s19  ;;  %p2175_p5 = scmp.lt.u32.totalorder %s2168_s19, %s3105_s3 }
  0x3b   : > { %p2171_p1 = pnand %p2169_p13, %p2592_p0 }
  0x3d   : > { %p2172_p6 = pneg %p2171_p1 }
  0x3f   : > { %p2177_p9 = pnand %p2175_p5, %p2172_p6 }
  0x41   : > { %2180 = shalt.err (!%p2177_p9)
}
  0x42   : > { %s2181_s20 = scalar_lea.vmem %s2580_s29, 32  ;;  %p2189_p4 = scmp.lt.s32.totalorder %s2580_s29, %s2580_s29 }
  0x43   : > { %p2182_p10 = scmp.ne.s32.totalorder %s2580_s29, %s2181_s20  ;;  %p2190_p7 = scmp.lt.s32.totalorder %s2181_s20, %s2181_s20 }
  0x45   : > { %p2184_p2 = pnand %p2182_p10, %p2592_p0  ;;  %p2191_p8 = por %p2190_p7, %p2189_p4 }
  0x47   : > { %p2185_p3 = pneg %p2184_p2 }
  0x49   : > { %p2192_p11 = pnand %p2191_p8, %p2185_p3 }
  0x4b   : > { %2195 = shalt.err (!%p2192_p11)
}
  0x4c   : > { %1960 = dma.hbm_to_vmem [thread:$0]  (!%p2576_p12), %s3105_s3, 32, %s2580_s29, [#allocation3]  }
  0x4d   : > { %s2196_s16 = scalar_lea.hbm %s3110_s8, 64 }
  0x4e   : > { %p2197_p13 = scmp.ne.s32.totalorder %s3110_s8, %s2196_s16  ;;  %p2203_p5 = scmp.lt.u32.totalorder %s2196_s16, %s3110_s8 }
  0x50   : > { %p2199_p1 = pnand %p2197_p13, %p2592_p0 }
  0x52   : > { %p2200_p6 = pneg %p2199_p1 }
  0x54   : > { %p2205_p9 = pnand %p2203_p5, %p2200_p6 }
  0x56   : > { %2208 = shalt.err (!%p2205_p9)
}
  0x57   : > { %s2209_s29 = scalar_lea.vmem %s2582_s23, 64  ;;  %p2217_p4 = scmp.lt.s32.totalorder %s2582_s23, %s2582_s23 }
  0x58   : > { %p2210_p10 = scmp.ne.s32.totalorder %s2582_s23, %s2209_s29  ;;  %p2218_p7 = scmp.lt.s32.totalorder %s2209_s29, %s2209_s29 }
  0x5a   : > { %p2212_p2 = pnand %p2210_p10, %p2592_p0  ;;  %p2219_p8 = por %p2218_p7, %p2217_p4 }
  0x5c   : > { %p2213_p3 = pneg %p2212_p2 }
  0x5e   : > { %p2220_p11 = pnand %p2219_p8, %p2213_p3 }
  0x60   : > { %2223 = shalt.err (!%p2220_p11)
}
  0x61   : > { %1966 = dma.hbm_to_vmem [thread:$0]  (!%p2576_p12), %s3110_s8, 64, %s2582_s23, [#allocation6]  }
  0x62   : > { %s2423_s15 = smov [#allocation8]   ;;  %s2224_s17 = scalar_lea.hbm %s3112_s10, 16 }
  0x63   : > { %s492_s21 = sshll.u32 %s2423_s15, 4  ;;  %p2225_p13 = scmp.ne.s32.totalorder %s3112_s10, %s2224_s17  ;;  %s493_s21 = int_to_ptr.vmem [resolvable:$true] %s492_s21 }
  0x64   : > { %p2231_p5 = scmp.lt.u32.totalorder %s2224_s17, %s3112_s10 }
  0x65   : > { %p2227_p1 = pnand %p2225_p13, %p2592_p0 }
  0x67   : > { %p2228_p6 = pneg %p2227_p1 }
  0x69   : > { %p2233_p9 = pnand %p2231_p5, %p2228_p6 }
  0x6b   : > { %2236 = shalt.err (!%p2233_p9)
}
  0x6c   : > { %s2237_s23 = scalar_lea.vmem %s493_s21, 16  ;;  %s2244_s20 = scalar_lea.vmem %s493_s21, 32 }
  0x6d   : > { %p2238_p10 = scmp.ne.s32.totalorder %s493_s21, %s2237_s23  ;;  %p2245_p4 = scmp.lt.s32.totalorder %s493_s21, %s493_s21 }
  0x6e   : > { %p2246_p7 = scmp.lt.s32.totalorder %s2244_s20, %s2237_s23 }
  0x6f   : > { %p2240_p2 = pnand %p2238_p10, %p2592_p0 }
  0x70   : > { %p2247_p8 = por %p2246_p7, %p2245_p4 }
  0x71   : > { %p2241_p3 = pneg %p2240_p2 }
  0x73   : > { %p2248_p11 = pnand %p2247_p8, %p2241_p3 }
  0x75   : > { %2251 = shalt.err (!%p2248_p11)
}
  0x76   : > { %1969 = dma.hbm_to_vmem [thread:$0]  (!%p2576_p12), %s3112_s10, 16, %s493_s21, [#allocation9]  }
  0x77   : > { %p3148_p13 = scmp.ne.s32.totalorder %s3145_s18, 0 }
  0x78   : > { %p3149_p1 = scmp.eq.s32.totalorder (!%p3148_p13), %s2538_s25, 0 }
  0x79   : > { %525 = sbr.rel (%p3148_p13) target bundleno = 847 (0x34f), region = 72 }
  0x80   : > { %2381 = dma.done.wait (%p3149_p1), [#allocation3], 32   ;;  %p3150_p0 = pmov %p3149_p1 }
  0x82   : > { %2383 = vsyncadd (%p3150_p0), [#allocation3], 4294967264  ;;  %p3151_p6 = pmov %p3150_p0 }
  0x83   : > { %p3152_p5 = pmov %p3150_p0 }
  0x84   : > { %2385 = dma.done.wait (%p3151_p6), [#allocation6], 128  }
  0x85   : > { %2387 = vsyncadd (%p3152_p5), [#allocation6], 4294967168  ;;  %p3153_p9 = pmov %p3150_p0 }
  0x86   : > { %p3154_p12 = pmov %p3150_p0 }
  0x87   : > { %2389 = dma.done.wait (%p3153_p9), [#allocation9], 16  }
  0x88   : > { %2391 = vsyncadd (%p3154_p12), [#allocation9], 4294967280  ;;  %v2424_v0 = vmov 0   ;;  %p605_p10 = scmp.lt.s32.totalorder %s2538_s25, 1  ;;  %v2032_v1 = vld [vmem:[%s3104_s2 + $0x4] ss:$8 sps:$4 sm:$0xff]   ;;  %v626_v20 = vlaneseq }
  0x89   : > { %712 = vmatprep.mubr.bf16.mxu0 %v2424_v0  ;;  %v2034_v2 = vld [vmem:[%s3104_s2] ss:$8 sps:$4 sm:$0xff]   ;;  %680 = vmatprep.subr.bf16.mxu0 %v2032_v1  ;;  %v2035_v3 = vld [vmem:[%s3104_s2 + $0x14] ss:$8 sps:$4 sm:$0xff]   ;;  %v2037_v4 = vld [vmem:[%s3104_s2 + $0x10] ss:$8 sps:$4 sm:$0xff]  }
  0x8a   : > { %s606_s26 = scalar_select %p605_p10, %s2538_s25, 1  ;;  %681 = vmatpush1.bf16.msra.mxu0 %v2034_v2  ;;  %v2038_v5 = vld [vmem:[%s3104_s2 + $0x24] ss:$8 sps:$4 sm:$0xff]   ;;  %v2040_v6 = vld [vmem:[%s3104_s2 + $0x20] ss:$8 sps:$4 sm:$0xff]   ;;  %vm676_vm0 = vcmask 523264  }
  0x8b   : > { %682 = vmatprep.subr.bf16.mxu0 %v2035_v3  ;;  %v2041_v7 = vld [vmem:[%s3104_s2 + $0x34] ss:$8 sps:$4 sm:$0xff]   ;;  %v2043_v8 = vld [vmem:[%s3104_s2 + $0x30] ss:$8 sps:$4 sm:$0xff]   ;;  %s3155_s30 = sld [smem:[#allocation28_spill]]  ;;  %vm745_vm1 = vcmask 1043456  }
  0x8c   : > { %s1762_s27 = sshll.u32 %s606_s26, 3  ;;  %v740_v12 = vld [vmem:[#allocation5] sm:$0xf]  ;;  %v2044_v13 = vld [vmem:[%s3108_s6] sm:$0xff]   ;;  %v2425_v14 = vmov 0.0   ;;  %vm2426_vm2 = vmmov 0  }
  0x8d   : > { %s612_s24 = scalar_lea.vmem %s3103_s1, %s1762_s27  ;;  %v747_v15 = vsel %vm745_vm1, %v740_v12, 0  ;;  %1909 = vmatprep.subr.bf16.mxu1 %v2425_v14  ;;  %vm741_vm3 = vcmask 64512   ;;  %v2045_v17 = vld [vmem:[%s3107_s5] sm:$0xff]   ;;  %v2046_v18 = vld [vmem:[%s3108_s6 + $0x8] sm:$0xff]   ;;  %1917 = vmatprep.mubr.msk.bf16.mxu1 %vm2426_vm2, %v2425_v14  ;;  %v2749_v21 = vshrl.u32 %v626_v20, 7  ;;  %v2048_v37 = vld [vmem:[%s3108_s6 + $0x10] sm:$0xff]  }
  0x8e   : > { %683 = vmatpush1.bf16.msra.mxu0 %v2037_v4  ;;  %v614_v9 = vld [vmem:[%s612_s24] sm:$0xff]  ;;  %1910 = vmatpush3.bf16.msra.mxu1 %v2044_v13  ;;  %v2047_v19 = vld [vmem:[%s3107_s5 + $0x8] sm:$0xff]   ;;  %v624_v23 = vld [vmem:[#allocation2] sm:$0x3]  ;;  %s2772_s20 = sand.u32 1, %s2410_s22   ;;  %s2427_s28 = smov 64  }
  0x8f   : > { %684 = vmatprep.subr.bf16.mxu0 %v2038_v5  ;;  %v615_v10 = vpack.c.bf16 %v614_v9, %v614_v9  ;;  %1911 = vmatprep.subr.bf16.mxu1 %v2425_v14  ;;  %v628_v22 = vsub.s32 0, %v2749_v21  ;;  %v632_v24 = vsub.s32 1, %v2749_v21  ;;  %v2049_v39 = vld [vmem:[%s3107_s5 + $0x10] sm:$0xff]   ;;  %v2050_v43 = vld [vmem:[%s3108_s6 + $0x18] sm:$0xff]   ;;  %v2054_v45 = vld [vmem:[%s3113_s11 + $0x4] ss:$8 sps:$4 sm:$0xff]  }
  0x90   : > { %v2051_v44 = vld [vmem:[%s3107_s5 + $0x18] sm:$0xff]   ;;  %s1758_s15 = sshll.u32 %s2772_s20, 4  ;;  %v2052_v57 = vld [vmem:[%s3113_s11] ss:$8 sps:$4 sm:$0xff]   ;;  %v2061_v1 = vld [vmem:[%s3113_s11 + $0x24] ss:$8 sps:$4 sm:$0xff]  }
  0x91   : > { %s608_s29 = scalar_lea.vmem %s3155_s30, %s1762_s27  ;;  %v629_v25 = vrot.slane %v624_v23, %v628_v22  ;;  %v633_v26 = vrot.slane %v624_v23, %v632_v24  ;;  %s2783_s18 = scalar_lea.vmem [#allocation10], %s1758_s15  ;;  %v975_v56 = vld [vmem:[#allocation7] sm:$0xf]  ;;  %v2058_v63 = vld [vmem:[%s3111_s9 + $0x40] sm:$0xff]   ;;  %v2063_v4 = vld [vmem:[%s3111_s9 + $0x48] sm:$0xff]  }
  0x92   : > { %685 = vmatpush1.bf16.msra.mxu0 %v2040_v6  ;;  %v737_v11 = vld [vmem:[%s608_s29] sm:$0xff]  ;;  %1912 = vmatpush3.bf16.msra.mxu1 %v2046_v18  ;;  %v2057_v60 = vld [vmem:[%s3113_s11 + $0x14] ss:$8 sps:$4 sm:$0xff]   ;;  %v977_v62 = vsel %vm745_vm1, %v975_v56, 0  ;;  %v2055_v0 = vld [vmem:[%s3113_s11 + $0x10] ss:$8 sps:$4 sm:$0xff]  }
  0x93   : > { %686 = vmatprep.subr.bf16.mxu0 %v2041_v7  ;;  %v2725_v16 = vpack.c.bf16 %v737_v11, %v737_v11  ;;  %1913 = vmatprep.subr.bf16.mxu1 %v2425_v14  ;;  %v2059_v2 = vld [vmem:[%s3113_s11 + $0x20] ss:$8 sps:$4 sm:$0xff]   ;;  %v2066_v5 = vld [vmem:[%s3113_s11 + $0x34] ss:$8 sps:$4 sm:$0xff]   ;;  %v2064_v6 = vld [vmem:[%s3113_s11 + $0x30] ss:$8 sps:$4 sm:$0xff]  }
  0x94   : > { %v2062_v3 = vld [vmem:[%s3111_s9] sm:$0xff]   ;;  %v2067_v7 = vld [vmem:[%s3111_s9 + $0x8] sm:$0xff]   ;;  %v2072_v11 = vld [vmem:[%s3111_s9 + $0x10] sm:$0xff]   ;;  %s3132_s12 = sshll.u32 %s2538_s25, 8  ;;  %s1472_s16 = scalar_lea.sflag [#allocation4], %s2772_s20 }
  0x95   : > { %v2071_v9 = vld [vmem:[%s3113_s11 + $0x44] ss:$8 sps:$4 sm:$0xff]   ;;  %v2073_v12 = vld [vmem:[%s3111_s9 + $0x58] sm:$0xff]   ;;  %v2079_v18 = vld [vmem:[%s3113_s11 + $0x60] ss:$8 sps:$4 sm:$0xff]   ;;  %s2948_s26 = scalar_lea.hbm %s3115_s13, %s3132_s12  ;;  %p3156_p3 = scmp.ne.s32.totalorder %s3142_s0, 0 }
  0x96   : > { %687 = vmatpush1.bf16.msra.mxu0 %v2043_v8  ;;  %1914 = vmatpush3.bf16.msra.mxu1 %v2048_v37  ;;  %v2068_v8 = vld [vmem:[%s3111_s9 + $0x50] sm:$0xff]   ;;  %v2083_v20 = vld [vmem:[%s3111_s9 + $0x68] sm:$0xff]   ;;  %s2428_s19 = smov [#allocation10]  }
  0x97   : > { %1891 = vmatprep.subr.bf16.mxu0 %v2425_v14  ;;  %1915 = vmatprep.subr.bf16.mxu1 %v2425_v14  ;;  %v2076_v13 = vld [vmem:[%s3113_s11 + $0x54] ss:$8 sps:$4 sm:$0xff]   ;;  %s2256_s30 = sshll.u32 %s2428_s19, 4  ;;  %s2257_s30 = int_to_ptr.vmem [resolvable:$false] %s2256_s30 }
  0x98   : > { %v2086_v23 = vld [vmem:[%s3113_s11 + $0x74] ss:$8 sps:$4 sm:$0xff]   ;;  %s2258_s29 = scalar_lea.vmem %s2257_s30, 512 }
  0x99   : > { %1772 = vmatmul.mubr.msk.bf16.vlgmr.msra.gmra.mrb[0].mxu0 %vm676_vm0, %v615_v10  ;;  %v2069_v10 = vld [vmem:[%s3113_s11 + $0x40] ss:$8 sps:$4 sm:$0xff]  }
  0x9a   : > { %1892 = vmatpush3.bf16.msra.mxu0 %v747_v15  ;;  %1893 = vmatprep.mubr.msk.bf16.mxu0 %vm2426_vm2, %v2425_v14  ;;  %v2077_v15 = vld [vmem:[%s3111_s9 + $0x18] sm:$0xff]  }
  0x9b   : > { %1897 = vmatprep.subr.bf16.mxu0 %v2425_v14  ;;  %1916 = vmatpush3.bf16.msra.mxu1 %v2050_v43  ;;  %v2107_v43 = vld [vmem:[%s3113_s11 + $0xd0] ss:$8 sps:$4 sm:$0xff]  }
  0x9c   : > { %1403 = vmatprep.subr.bf16.mxu1 %v2054_v45  ;;  %v2110_v45 = vld [vmem:[%s3113_s11 + $0xe0] ss:$8 sps:$4 sm:$0xff]  }
  0xa1   : > { %1894 = vmatmul.mubr.msk.bf16.vlgmr.msra.gmra.mrb[4].mxu0 %vm741_vm3, %v2725_v16 }
  0xa2   : > { %1898 = vmatpush3.bf16.msra.mxu0 %v2045_v17  ;;  %1905 = vmatprep.mubr.msk.bf16.mxu0 %vm2426_vm2, %v2425_v14  ;;  %v2081_v17 = vld [vmem:[%s3113_s11 + $0x64] ss:$8 sps:$4 sm:$0xff]  }
  0xa3   : > { %1899 = vmatprep.subr.bf16.mxu0 %v2425_v14 }
  0xa6   : > { %1900 = vmatpush3.bf16.msra.mxu0 %v2047_v19  ;;  %v2082_v19 = vld [vmem:[%s3111_s9 + $0x20] sm:$0xff]  }
  0xa7   : > { %1901 = vmatprep.subr.bf16.mxu0 %v2425_v14 }
  0xaa   : > { %1902 = vmatpush3.bf16.msra.mxu0 %v2049_v39  ;;  %v2101_v39 = vld [vmem:[%s3113_s11 + $0xb0] ss:$8 sps:$4 sm:$0xff]  }
  0xab   : > { %1903 = vmatprep.subr.bf16.mxu0 %v2425_v14 }
  0xae   : > { %1904 = vmatpush3.bf16.msra.mxu0 %v2051_v44  ;;  %v2112_v44 = vld [vmem:[%s3113_s11 + $0xe4] ss:$8 sps:$4 sm:$0xff]  }
  0xaf   : > { %1921 = vmatprep.subr.bf16.mxu0 %v2425_v14 }
 0x16c   : > { %v714_v27 = vpop.f32.mrb[0].mxu0 }
 0x16d   : > { %v715_v28 = vadd.f32 %v714_v27, %v629_v25  ;;  %v716_v29 = vpop.f32.mrb[1].mxu0  ;;  %v2084_v25 = vld [vmem:[%s3113_s11 + $0x70] ss:$8 sps:$4 sm:$0xff]  }
 0x16e   : > { %v717_v30 = vadd.f32 %v716_v29, %v633_v26  ;;  %v718_v31 = vpop.f32.mrb[2].mxu0  ;;  %v2087_v26 = vld [vmem:[%s3111_s9 + $0x28] sm:$0xff]   ;;  %v2088_v27 = vld [vmem:[%s3111_s9 + $0x70] sm:$0xff]  }
 0x16f   : > { %v1773_v32 = vmul.f32 -2.0, %v715_v28  ;;  %v719_v33 = vpop.f32.mrb[3].mxu0  ;;  %v2091_v28 = vld [vmem:[%s3113_s11 + $0x84] ss:$8 sps:$4 sm:$0xff]   ;;  %v2089_v29 = vld [vmem:[%s3113_s11 + $0x80] ss:$8 sps:$4 sm:$0xff]  }
 0x170   : > { %v1774_v34 = vmul.f32 -2.0, %v717_v30  ;;  %v2092_v30 = vld [vmem:[%s3111_s9 + $0x30] sm:$0xff]   ;;  %v2093_v31 = vld [vmem:[%s3111_s9 + $0x78] sm:$0xff]  }
 0x171   : > { %v725_v35 = vmul.f32 1.442695, %v1773_v32  ;;  %v2096_v32 = vld [vmem:[%s3113_s11 + $0x94] ss:$8 sps:$4 sm:$0xff]   ;;  %v2094_v33 = vld [vmem:[%s3113_s11 + $0x90] ss:$8 sps:$4 sm:$0xff]  }
 0x172   : > { %v727_v36 = vmul.f32 1.442695, %v1774_v34  ;;  %v2097_v34 = vld [vmem:[%s3111_s9 + $0x38] sm:$0xff]  }
 0x173   : > { %2116 = vpow2.f32 %v725_v35  ;;  %v2100_v35 = vld [vmem:[%s3113_s11 + $0xa4] ss:$8 sps:$4 sm:$0xff]  }
 0x174   : > { %2118 = vpow2.f32 %v727_v36  ;;  %v2098_v36 = vld [vmem:[%s3113_s11 + $0xa0] ss:$8 sps:$4 sm:$0xff]  }
 0x17d   : > { %v2117_v38 = vpop.eup %2116 }
 0x17e   : > { %v2119_v40 = vpop.eup %2118  ;;  %v729_v41 = vadd.f32 1.0, %v2117_v38  ;;  %v2103_v38 = vld [vmem:[%s3113_s11 + $0xb4] ss:$8 sps:$4 sm:$0xff]  }
 0x17f   : > { %v730_v42 = vadd.f32 1.0, %v2119_v40  ;;  %v2106_v40 = vld [vmem:[%s3113_s11 + $0xc4] ss:$8 sps:$4 sm:$0xff]  }
 0x180   : > { %2120 = vrcp.f32 %v729_v41  ;;  %v2104_v41 = vld [vmem:[%s3113_s11 + $0xc0] ss:$8 sps:$4 sm:$0xff]  }
 0x181   : > { %2122 = vrcp.f32 %v730_v42  ;;  %v2109_v42 = vld [vmem:[%s3113_s11 + $0xd4] ss:$8 sps:$4 sm:$0xff]  }
 0x18a   : > { %v2779_v46 = vpop.eup %2120 }
 0x18b   : > { %v2123_v47 = vpop.eup %2122  ;;  %735 = vst [vmem:[%s2783_s18] sm:$0xff] %v2779_v46  ;;  %798 = vrot.lane.b32.xlu0 %v2779_v46, %s2427_s28  ;;  %v1028_v37 = vpack.c.bf16 %v2779_v46, %v2779_v46 }
 0x18c   : > { %736 = vst [vmem:[%s2783_s18 + $0x8] sm:$0xff] %v2123_v47  ;;  %v1210_v61 = vpack.c.bf16 %v2123_v47, %v2123_v47 }
 0x18f   : > { %807 = vrot.lane.b32.xlu0 %v2123_v47, %s2427_s28  ;;  %s1501_s28 = sshll.u32 %s2783_s18, 4  ;;  %s1502_s28 = int_to_ptr.vmem [resolvable:$true] %s1501_s28 }
 0x190   : > { %s2252_s17 = scalar_lea.vmem %s1502_s28, 256  ;;  %p2259_p8 = scmp.lt.s32.totalorder %s1502_s28, %s2257_s30 }
 0x191   : > { %p2253_p2 = scmp.ne.s32.totalorder %s1502_s28, %s2252_s17  ;;  %p2260_p11 = scmp.lt.s32.totalorder %s2258_s29, %s2252_s17 }
 0x193   : > { %p2254_p4 = pnand %p2253_p2, %p3156_p3  ;;  %p2261_p13 = por %p2260_p11, %p2259_p8 }
 0x195   : > { %p2255_p7 = pneg %p2254_p4 }
 0x197   : > { %p2262_p1 = pnand %p2261_p13, %p2255_p7 }
 0x1fd   : > { %v799_v48 = vpop.permute.xlu0 %798 }
 0x1fe   : > { %v801_v49 = vmax.f32 %v2779_v46, %v799_v48  ;;  %v802_v50 = vmin.f32 %v2779_v46, %v799_v48  ;;  %v2115_v46 = vld [vmem:[%s3113_s11 + $0xf4] ss:$8 sps:$4 sm:$0xff]  }
 0x200   : > { %v804_v51 = vmax.f32 %v801_v49, %v2123_v47  ;;  %v805_v52 = vmin.f32 %v802_v50, %v2123_v47  ;;  %v2113_v47 = vld [vmem:[%s3113_s11 + $0xf0] ss:$8 sps:$4 sm:$0xff]  }
 0x201   : > { %v808_v53 = vpop.permute.xlu0 %807 }
 0x202   : > { %v810_v54 = vmax.f32 %v804_v51, %v808_v53  ;;  %v811_v55 = vmin.f32 %v805_v52, %v808_v53 }
 0x204   : > { %v812_v58 = vpack.c.bf16 %v810_v54, %v810_v54  ;;  %v889_v59 = vpack.c.bf16 %v811_v55, %v811_v55 }
 0x206   : > { %1906 = vmatmul.mubr.msk.bf16.vlgmr.msra.gmra.mrb[4].mxu0 %vm676_vm0, %v812_v58  ;;  %1918 = vmatmul.mubr.msk.bf16.vlgmr.msra.gmra.mrb[0].mxu1 %vm676_vm0, %v889_v59 }
 0x207   : > { %1404 = vmatpush1.bf16.msra.mxu1 %v2052_v57  ;;  %1435 = vmatprep.mubr.bf16.mxu1 %v1210_v61 }
 0x208   : > { %1405 = vmatprep.subr.bf16.mxu1 %v2057_v60  ;;  %1922 = vmatpush3.bf16.msra.mxu0 %v977_v62 }
 0x209   : > { %1923 = vmatprep.mubr.msk.bf16.mxu0 %vm2426_vm2, %v2425_v14  ;;  %1869 = vmatprep.subr.bf16.mxu0 %v2058_v63  ;;  %v2074_v14 = vld [vmem:[%s3113_s11 + $0x50] ss:$8 sps:$4 sm:$0xff]  }
 0x20b   : > { %1406 = vmatpush1.bf16.msra.mxu1 %v2055_v0 }
 0x20c   : > { %1407 = vmatprep.subr.bf16.mxu1 %v2061_v1 }
 0x20e   : > { %1924 = vmatmul.mubr.msk.bf16.vlgmr.msra.gmra.mrb[8].mxu0 %vm741_vm3, %v2725_v16  ;;  %v2078_v16 = vld [vmem:[%s3111_s9 + $0x60] sm:$0xff]  }
 0x20f   : > { %1870 = vmatpush3.bf16.msra.mxu0 %v2062_v3  ;;  %1408 = vmatpush1.bf16.msra.mxu1 %v2059_v2 }
 0x210   : > { %1190 = vmatprep.mubr.bf16.mxu0 %v1210_v61  ;;  %1871 = vmatprep.subr.bf16.mxu0 %v2063_v4 }
 0x211   : > { %1409 = vmatprep.subr.bf16.mxu1 %v2066_v5 }
 0x213   : > { %1872 = vmatpush3.bf16.msra.mxu0 %v2067_v7  ;;  %1410 = vmatpush1.bf16.msra.mxu1 %v2064_v6 }
 0x214   : > { %1873 = vmatprep.subr.bf16.mxu0 %v2068_v8  ;;  %1411 = vmatprep.subr.bf16.mxu1 %v2071_v9 }
 0x217   : > { %1874 = vmatpush3.bf16.msra.mxu0 %v2072_v11  ;;  %1412 = vmatpush1.bf16.msra.mxu1 %v2069_v10 }
 0x218   : > { %1875 = vmatprep.subr.bf16.mxu0 %v2073_v12  ;;  %1413 = vmatprep.subr.bf16.mxu1 %v2076_v13 }
 0x21b   : > { %1876 = vmatpush3.bf16.msra.mxu0 %v2077_v15  ;;  %1414 = vmatpush1.bf16.msra.mxu1 %v2074_v14 }
 0x21c   : > { %1877 = vmatprep.subr.bf16.mxu0 %v2078_v16  ;;  %1415 = vmatprep.subr.bf16.mxu1 %v2081_v17 }
 0x21f   : > { %1878 = vmatpush3.bf16.msra.mxu0 %v2082_v19  ;;  %1416 = vmatpush1.bf16.msra.mxu1 %v2079_v18 }
 0x220   : > { %1879 = vmatprep.subr.bf16.mxu0 %v2083_v20  ;;  %1417 = vmatprep.subr.bf16.mxu1 %v2086_v23 }
 0x223   : > { %1880 = vmatpush3.bf16.msra.mxu0 %v2087_v26  ;;  %1418 = vmatpush1.bf16.msra.mxu1 %v2084_v25 }
 0x224   : > { %1881 = vmatprep.subr.bf16.mxu0 %v2088_v27  ;;  %1419 = vmatprep.subr.bf16.mxu1 %v2091_v28 }
 0x227   : > { %1882 = vmatpush3.bf16.msra.mxu0 %v2092_v30  ;;  %1420 = vmatpush1.bf16.msra.mxu1 %v2089_v29 }
 0x228   : > { %1883 = vmatprep.subr.bf16.mxu0 %v2093_v31  ;;  %1421 = vmatprep.subr.bf16.mxu1 %v2096_v32 }
 0x22b   : > { %1884 = vmatpush3.bf16.msra.mxu0 %v2097_v34  ;;  %1422 = vmatpush1.bf16.msra.mxu1 %v2094_v33 }
 0x22c   : > { %1423 = vmatprep.subr.bf16.mxu1 %v2100_v35 }
 0x22e   : > { %1191 = vmatmul.mubr.bf16.vlgmr.msra.gmra.mrb[12].mxu0 %v1028_v37 }
 0x22f   : > { %1424 = vmatpush1.bf16.msra.mxu1 %v2098_v36 }
 0x230   : > { %1425 = vmatprep.subr.bf16.mxu1 %v2103_v38 }
 0x233   : > { %1426 = vmatpush1.bf16.msra.mxu1 %v2101_v39 }
 0x234   : > { %1427 = vmatprep.subr.bf16.mxu1 %v2106_v40 }
 0x237   : > { %1428 = vmatpush1.bf16.msra.mxu1 %v2104_v41 }
 0x238   : > { %1429 = vmatprep.subr.bf16.mxu1 %v2109_v42 }
 0x23b   : > { %1430 = vmatpush1.bf16.msra.mxu1 %v2107_v43 }
 0x23c   : > { %1431 = vmatprep.subr.bf16.mxu1 %v2112_v44 }
 0x23f   : > { %1432 = vmatpush1.bf16.msra.mxu1 %v2110_v45 }
 0x240   : > { %1433 = vmatprep.subr.bf16.mxu1 %v2115_v46 }
 0x243   : > { %1434 = vmatpush1.bf16.msra.mxu1 %v2113_v47 }
 0x246   : > { %1436 = vmatmul.mubr.bf16.vlgmr.msra.gmra.mrb[4].mxu1 %v1028_v37 }
 0x247   : > { %2265 = shalt.err (!%p2262_p1)
}
 0x248   : > { %s2266_s18 = scalar_lea.hbm %s2948_s26, 256  ;;  %s2270_s21 = scalar_lea.hbm %s3115_s13, 512 }
 0x249   : > { %p2267_p0 = scmp.ne.s32.totalorder %s2948_s26, %s2266_s18  ;;  %p2271_p9 = scmp.lt.u32.totalorder %s2948_s26, %s3115_s13 }
 0x24a   : > { %p2272_p12 = scmp.lt.u32.totalorder %s2270_s21, %s2266_s18  ;;  %p2274_p2 = scmp.lt.u32.totalorder %s2266_s18, %s2948_s26 }
 0x24b   : > { %p2268_p6 = pnand %p2267_p0, %p3156_p3 }
 0x24c   : > { %p2273_p10 = por %p2272_p12, %p2271_p9 }
 0x24d   : > { %p2269_p5 = pneg %p2268_p6 }
 0x24e   : > { %p2275_p4 = por %p2274_p2, %p2273_p10 }
 0x250   : > { %p2276_p7 = pnand %p2275_p4, %p2269_p5 }
 0x252   : > { %2279 = shalt.err (!%p2276_p7)
}
 0x253   : > { %1949 = dma.vmem_to_hbm [thread:$0]  (%p3156_p3), %s1502_s28, 256, %s2948_s26, %s1472_s16   ;;  %v1776_v48 = vld [vmem:[%s3109_s7] ss:$0 sm:$0xff]  ;;  %vm972_vm4 = vcmask 130048  }
 0x254   : > { %s1759_s28 = sshll.u32 %s2772_s20, 3  ;;  %s1476_s26 = sand.u32 1, %s2538_s25  }
 0x255   : > { %s1847_s16 = sshll.u32 %s2538_s25, 7  ;;  %s590_s29 = scalar_lea.vmem [#allocation11], %s1759_s28 }
 0x256   : > { %s1514_s18 = sshll.u32 %s590_s29, 4  ;;  %s2981_s21 = scalar_lea.hbm %s3116_s14, %s1847_s16  ;;  %s2983_s18 = int_to_ptr.vmem [resolvable:$true] %s1514_s18 }
 0x257   : > { %s2985_s24 = scalar_lea.sflag [#allocation12], %s1476_s26  ;;  %s2280_s19 = scalar_lea.vmem %s2983_s18, 128 }
 0x258   : > { %p2281_p8 = scmp.ne.s32.totalorder %s2983_s18, %s2280_s19  ;;  %s2429_s17 = smov [#allocation11]  }
 0x259   : > { %s2284_s30 = sshll.u32 %s2429_s17, 4  ;;  %s2285_s30 = int_to_ptr.vmem [resolvable:$false] %s2284_s30 }
 0x25a   : > { %p2282_p11 = pnand %p2281_p8, %p3156_p3  ;;  %s2286_s23 = scalar_lea.vmem %s2285_s30, 256 }
 0x25b   : > { %p2287_p1 = scmp.lt.s32.totalorder %s2983_s18, %s2285_s30  ;;  %p2288_p0 = scmp.lt.s32.totalorder %s2286_s23, %s2280_s19 }
 0x25c   : > { %p2283_p13 = pneg %p2282_p11 }
 0x25d   : > { %p2289_p6 = por %p2288_p0, %p2287_p1 }
 0x25f   : > { %p2290_p5 = pnand %p2289_p6, %p2283_p13 }
 0x2d9   : > { %v882_v49 = vpop.f32.mrb[4].mxu0  ;;  %v959_v50 = vpop.f32.mrb[0].mxu1 }
 0x2da   : > { %v1927_v51 = vadd.f32 %v1776_v48, %v882_v49  ;;  %v1907_v52 = vpop.f32.mrb[5].mxu0  ;;  %v1919_v53 = vpop.f32.mrb[1].mxu1 }
 0x2db   : > { %v885_v54 = vpop.f32.mrb[6].mxu0  ;;  %v962_v55 = vpop.f32.mrb[2].mxu1 }
 0x2dc   : > { %v1928_v56 = vadd.f32 %v1927_v51, %v959_v50  ;;  %v1908_v57 = vpop.f32.mrb[7].mxu0  ;;  %v1920_v58 = vpop.f32.mrb[3].mxu1 }
 0x2de   : > { %v1787_v59 = vmul.f32 -1.442695, %v1928_v56 }
 0x2e0   : > { %2124 = vpow2.f32 %v1787_v59 }
 0x2e1   : > { %v1013_v60 = vpop.f32.mrb[8].mxu0 }
 0x2e2   : > { %v1925_v61 = vpop.f32.mrb[9].mxu0 }
 0x2e3   : > { %v1016_v62 = vpop.f32.mrb[10].mxu0 }
 0x2e4   : > { %v1926_v63 = vpop.f32.mrb[11].mxu0 }
 0x2ea   : > { %v2125_v0 = vpop.eup %2124 }
 0x2eb   : > { %v969_v1 = vadd.f32 1.0, %v2125_v0 }
 0x2ed   : > { %2126 = vrcp.f32 %v969_v1 }
 0x2f7   : > { %v2127_v2 = vpop.eup %2126 }
 0x2f8   : > { %973 = vst.msk [vmem:[%s590_s29] sm:$0xff] %vm972_vm4, %v2127_v2 }
 0x2f9   : > { %2293 = shalt.err (!%p2290_p5)
}
 0x2fa   : > { %s2294_s26 = scalar_lea.hbm %s2981_s21, 128  ;;  %s2298_s17 = scalar_lea.hbm %s3116_s14, 256 }
 0x2fb   : > { %p2295_p9 = scmp.ne.s32.totalorder %s2981_s21, %s2294_s26  ;;  %p2299_p2 = scmp.lt.u32.totalorder %s2981_s21, %s3116_s14 }
 0x2fc   : > { %p2300_p4 = scmp.lt.u32.totalorder %s2298_s17, %s2294_s26  ;;  %p2302_p8 = scmp.lt.u32.totalorder %s2294_s26, %s2981_s21 }
 0x2fd   : > { %p2296_p12 = pnand %p2295_p9, %p3156_p3 }
 0x2fe   : > { %p2301_p7 = por %p2300_p4, %p2299_p2 }
 0x2ff   : > { %p2297_p10 = pneg %p2296_p12 }
 0x300   : > { %p2303_p11 = por %p2302_p8, %p2301_p7 }
 0x302   : > { %p2304_p13 = pnand %p2303_p11, %p2297_p10 }
 0x304   : > { %2307 = shalt.err (!%p2304_p13)
}
 0x305   : > { %1950 = dma.vmem_to_hbm [thread:$0]  (%p3156_p3), %s2983_s18, 128, %s2981_s21, %s2985_s24   ;;  %v1789_v3 = vld [vmem:[#allocation8] ss:$0 sm:$0xff]  ;;  %v1885_v4 = vpop.f32.mrb[12].mxu0 }
 0x306   : > { %v1886_v5 = vpop.f32.mrb[13].mxu0  ;;  %v1025_v6 = vadd.f32 %v1789_v3, %v1013_v60  ;;  %s3157_s23 = sld [smem:[#allocation29_spill]]  ;;  %s597_s18 = scalar_lea.vmem [#allocation13], %s1759_s28 }
 0x307   : > { %v1887_v7 = vadd.f32 %v1886_v5, %v1885_v4  ;;  %v1888_v8 = vpop.f32.mrb[14].mxu0  ;;  %s1527_s21 = sshll.u32 %s597_s18, 4  ;;  %s3158_s27 = sld [smem:[#allocation30_spill]]  ;;  %s3025_s21 = int_to_ptr.vmem [resolvable:$true] %s1527_s21 }
 0x308   : > { %v1889_v9 = vpop.f32.mrb[15].mxu0  ;;  %s2308_s30 = scalar_lea.vmem %s3025_s21, 128  ;;  %s2430_s28 = smov [#allocation13]  }
 0x309   : > { %v1198_v10 = vadd.f32 %v1887_v7, %v1025_v6  ;;  %p2309_p1 = scmp.ne.s32.totalorder %s3025_s21, %s2308_s30  ;;  %s2312_s12 = sshll.u32 %s2430_s28, 4  ;;  %s2313_s12 = int_to_ptr.vmem [resolvable:$false] %s2312_s12 }
 0x30a   : > { %s2314_s19 = scalar_lea.vmem %s2313_s12, 256  ;;  %p2315_p5 = scmp.lt.s32.totalorder %s3025_s21, %s2313_s12 }
 0x30b   : > { %v1806_v11 = vmul.f32 -1.442695, %v1198_v10  ;;  %p2310_p0 = pnand %p2309_p1, %p3156_p3  ;;  %p2316_p9 = scmp.lt.s32.totalorder %s2314_s19, %s2308_s30 }
 0x30c   : > { %v1206_v13 = vld [vmem:[%s3157_s23] sm:$0x3] }
 0x30d   : > { %2128 = vpow2.f32 %v1806_v11  ;;  %v1448_v15 = vrot.slane %v1206_v13, %v628_v22  ;;  %v1452_v16 = vrot.slane %v1206_v13, %v632_v24  ;;  %s3023_s17 = scalar_lea.hbm %s3158_s27, %s1847_s16  ;;  %p2311_p6 = pneg %p2310_p0 }
 0x30e   : > { %p2317_p12 = por %p2316_p9, %p2315_p5 }
 0x310   : > { %p2318_p10 = pnand %p2317_p12, %p2311_p6 }
 0x317   : > { %v2129_v12 = vpop.eup %2128 }
 0x318   : > { %v1202_v14 = vadd.f32 1.0, %v2129_v12 }
 0x319   : > { %v1437_v17 = vpop.f32.mrb[4].mxu1 }
 0x31a   : > { %2130 = vrcp.f32 %v1202_v14  ;;  %v1455_v18 = vadd.f32 %v1448_v15, %v1437_v17  ;;  %v1439_v19 = vpop.f32.mrb[5].mxu1 }
 0x31b   : > { %v1456_v20 = vadd.f32 %v1452_v16, %v1439_v19  ;;  %v1441_v23 = vpop.f32.mrb[6].mxu1 }
 0x31c   : > { %v1839_v25 = vmul.f32 -1.442695, %v1455_v18  ;;  %v1442_v26 = vpop.f32.mrb[7].mxu1 }
 0x31d   : > { %v1840_v27 = vmul.f32 -1.442695, %v1456_v20 }
 0x31e   : > { %2132 = vpow2.f32 %v1839_v25 }
 0x31f   : > { %2134 = vpow2.f32 %v1840_v27 }
 0x324   : > { %v2131_v21 = vpop.eup %2130 }
 0x325   : > { %1205 = vst.msk [vmem:[%s597_s18] sm:$0xff] %vm676_vm0, %v2131_v21 }
 0x326   : > { %2321 = shalt.err (!%p2318_p10)
}
 0x327   : > { %s2322_s16 = scalar_lea.hbm %s3023_s17, 128  ;;  %s2326_s26 = scalar_lea.hbm %s3158_s27, 256 }
 0x328   : > { %p2323_p2 = scmp.ne.s32.totalorder %s3023_s17, %s2322_s16  ;;  %p2327_p8 = scmp.lt.u32.totalorder %s3023_s17, %s3158_s27 }
 0x329   : > { %p2328_p11 = scmp.lt.u32.totalorder %s2326_s26, %s2322_s16  ;;  %p2330_p1 = scmp.lt.u32.totalorder %s2322_s16, %s3023_s17 }
 0x32a   : > { %p2324_p4 = pnand %p2323_p2, %p3156_p3 }
 0x32b   : > { %p2329_p13 = por %p2328_p11, %p2327_p8 }
 0x32c   : > { %p2325_p7 = pneg %p2324_p4 }
 0x32d   : > { %p2331_p0 = por %p2330_p1, %p2329_p13 }
 0x32f   : > { %p2332_p6 = pnand %p2331_p0, %p2325_p7 }
 0x331   : > { %2335 = shalt.err (!%p2332_p6)
}
 0x332   : > { %1951 = dma.vmem_to_hbm [thread:$0]  (%p3156_p3), %s3025_s21, 128, %s3023_s17, %s2985_s24   ;;  %v2133_v22 = vpop.eup %2132 }
 0x333   : > { %v2135_v24 = vpop.eup %2134  ;;  %v1463_v28 = vadd.f32 1.0, %v2133_v22  ;;  %s604_s30 = scalar_lea.vmem [#allocation14], %s1758_s15  ;;  %s3159_s19 = sshll.u32 %s2538_s25, 8 }
 0x334   : > { %v1464_v29 = vadd.f32 1.0, %v2135_v24  ;;  %s1541_s12 = sshll.u32 %s604_s30, 4  ;;  %s3160_s18 = sld [smem:[#allocation31_spill]]  ;;  %s3059_s12 = int_to_ptr.vmem [resolvable:$true] %s1541_s12 }
 0x335   : > { %2136 = vrcp.f32 %v1463_v28  ;;  %s1487_s24 = scalar_lea.sflag [#allocation15], %s2772_s20  ;;  %s2336_s21 = scalar_lea.vmem %s3059_s12, 256 }
 0x336   : > { %2138 = vrcp.f32 %v1464_v29  ;;  %p2337_p5 = scmp.ne.s32.totalorder %s3059_s12, %s2336_s21  ;;  %s2431_s25 = smov [#allocation14]  }
 0x337   : > { %s2340_s15 = sshll.u32 %s2431_s25, 4  ;;  %s2341_s15 = int_to_ptr.vmem [resolvable:$false] %s2340_s15 }
 0x338   : > { %p2338_p9 = pnand %p2337_p5, %p3156_p3  ;;  %s2342_s17 = scalar_lea.vmem %s2341_s15, 512 }
 0x339   : > { %p2343_p10 = scmp.lt.s32.totalorder %s3059_s12, %s2341_s15  ;;  %p2344_p2 = scmp.lt.s32.totalorder %s2342_s17, %s2336_s21 }
 0x33a   : > { %s3057_s26 = scalar_lea.hbm %s3160_s18, %s3159_s19  ;;  %p2339_p12 = pneg %p2338_p9 }
 0x33b   : > { %p2345_p4 = por %p2344_p2, %p2343_p10 }
 0x33d   : > { %p2346_p7 = pnand %p2345_p4, %p2339_p12 }
 0x33f   : > { %v2137_v30 = vpop.eup %2136 }
 0x340   : > { %v2139_v31 = vpop.eup %2138  ;;  %1469 = vst [vmem:[%s604_s30] sm:$0xff] %v2137_v30 }
 0x341   : > { %1470 = vst [vmem:[%s604_s30 + $0x8] sm:$0xff] %v2139_v31 }
 0x342   : > { %2349 = shalt.err (!%p2346_p7)
}
 0x343   : > { %s2350_s20 = scalar_lea.hbm %s3057_s26, 256  ;;  %s2354_s30 = scalar_lea.hbm %s3160_s18, 512 }
 0x344   : > { %p2351_p8 = scmp.ne.s32.totalorder %s3057_s26, %s2350_s20  ;;  %p2355_p1 = scmp.lt.u32.totalorder %s3057_s26, %s3160_s18 }
 0x345   : > { %p2356_p0 = scmp.lt.u32.totalorder %s2354_s30, %s2350_s20  ;;  %p2358_p5 = scmp.lt.u32.totalorder %s2350_s20, %s3057_s26 }
 0x346   : > { %p2352_p11 = pnand %p2351_p8, %p3156_p3 }
 0x347   : > { %p2357_p6 = por %p2356_p0, %p2355_p1 }
 0x348   : > { %p2353_p13 = pneg %p2352_p11 }
 0x349   : > { %p2359_p9 = por %p2358_p5, %p2357_p6 }
 0x34b   : > { %p2360_p12 = pnand %p2359_p9, %p2353_p13 }
 0x34d   : > { %2363 = shalt.err (!%p2360_p12)
}
 0x34e   : > { %1952 = dma.vmem_to_hbm [thread:$0]  (%p3156_p3), %s3059_s12, 256, %s3057_s26, %s1487_s24  }
 0x34f PF: > { %s3161_s23 = sld [smem:[#allocation24_spill]]  ;;  %s3162_s21 = sld [smem:[#allocation22_spill]] }
 0x350   : > { %s3163_s25 = sld [smem:[#allocation27_spill]] }
 0x355   : > { %p1991_p10 = scmp.ge.s32.totalorder %s3161_s23, 2  ;;  %s1553_s15 = sand.u32 1, %s3162_s21  }
 0x356   : > { %p3164_p2 = scmp.ne.s32.totalorder %s3163_s25, 0  ;;  %s1554_s17 = scalar_lea.sflag [#allocation4], %s1553_s15 }
 0x358   : > { %p1971_p4 = pnand %p1991_p10, %p3164_p2 }
 0x35a   : > { %2393 = dma.done.wait (!%p1971_p4), %s1554_s17, 256  }
 0x35b   : > { %2395 = vsyncadd (!%p1971_p4), %s1554_s17, 4294967040  ;;  %s3165_s20 = sadd.s32 4294967294, %s3161_s23  }
 0x35c   : > { %s1562_s29 = sand.u32 1, %s3165_s20  }
 0x35d   : > { %s1563_s28 = scalar_lea.sflag [#allocation12], %s1562_s29 }
 0x35e   : > { %2397 = dma.done.wait (!%p1971_p4), %s1563_s28, 256  }
 0x35f   : > { %2399 = vsyncadd (!%p1971_p4), %s1563_s28, 4294967040  ;;  %s1581_s0 = scalar_lea.sflag [#allocation15], %s1553_s15 }
 0x360   : > { %2401 = dma.done.wait (!%p1971_p4), %s1581_s0, 256  }
 0x361   : > { %2403 = vsyncadd (!%p1971_p4), %s1581_s0, 4294967040  ;;  %s3166_s24 = sld [smem:[#allocation25_spill]]  ;;  %s3167_s12 = sld [smem:[#allocation23_spill]] }
 0x362   : > { %s3168_s23 = sld [smem:[#allocation26_spill]]  ;;  %s3169_s21 = smov %s2410_s22 }
 0x367   : > { %p36_p3 = scmp.ge.s32.totalorder %s3166_s24, 4   ;;  %s3170_s22 = smov %s3167_s12 }
 0x369   :  { %38 = sbr.rel (!%p36_p3) target bundleno = 15 (0xf), region = 176 }
 0x370   :  { %1586 = vsyncpa [#allocation3], 1 }
 0x371   :  { %1588 = vsyncpa [#allocation3 + $0x1], 1 }
 0x372   :  { %1589 = vsyncpa [#allocation6], 1 }
 0x373   :  { %1590 = vsyncpa [#allocation9], 1 }
 0x374   :  { %1591 = vsyncpa [#allocation4], 1 }
 0x375   :  { %1593 = vsyncpa [#allocation4 + $0x1], 1 }
 0x376   :  { %1594 = vsyncpa [#allocation12], 1 }
 0x377   :  { %1596 = vsyncpa [#allocation12 + $0x1], 1 }
 0x378   :  { %1597 = vsyncpa [#allocation15], 1 }
 0x379   :  { %1599 = vsyncpa [#allocation15 + $0x1], 1 }

</bundles_post_ra>
